<compile_context>
chip_gen: v7x
topology: tpu7x:2x2x1
jax: 0.10.0
libtpu: 0.0.40
codegen_flags: <defaults>
</compile_context>

<pallas_src>
import functools
import math

import jax
import jax.numpy as jnp
from jax.experimental import pallas as pl
from jax.experimental.pallas import tpu as pltpu


LANE = 128


def _round_up(x, m):
    return ((x + m - 1) // m) * m


# ------------- fused backbone conv (3x3, stride 2) + neck (1x1 conv) --------------

def _conv_neck_kernel(x_ref, weq_ref, bconv_ref, wneck_ref, bneck_ref,
                      f_ref, t_ref, *, m_rows, wh):
    """One grid step over the whole (batch-folded) problem.

    x_ref:     (Mx, 4C)   f32  space-to-depth input slab (batch folded into rows,
                               plus halo rows so every tap slice stays in bounds).
    weq_ref:   (4, 4C, Cout) bf16  the 4 taps of the equivalent stride-1 2x2 conv.
    bconv_ref: (1, Cout)  f32
    wneck_ref: (Cout, Dp) bf16  neck weight, N zero-padded to Dp=128 (lane dense).
    bneck_ref: (1, Dp)    f32
    f_ref:     (M, Cout)  bf16  backbone feature (input of the next backbone stage).
    t_ref:     (M, Dp)    bf16  neck output tokens (lane-dense 128-wide store).
    """
    cout = weq_ref.shape[-1]
    acc = jnp.zeros((m_rows, cout), jnp.float32)
    # One MXU dot per 2x2 tap over the whole flattened slab (large M, 4 dots total).
    for tap in range(4):                       # static 4-iteration unroll
        dh, dw = tap // 2, tap % 2
        xs = x_ref[pl.ds(dh * wh + dw, m_rows), :].astype(jnp.bfloat16)
        acc = acc + jnp.dot(xs, weq_ref[tap], preferred_element_type=jnp.float32)

    f = jnp.maximum(acc + bconv_ref[...], 0.0)               # (M, Cout) f32
    f_ref[...] = f.astype(f_ref.dtype)                       # bf16 backbone feature

    # Fused neck 1x1-conv epilogue: no HBM round trip of the backbone feature map.
    t = jnp.dot(f.astype(jnp.bfloat16), wneck_ref[...],
                preferred_element_type=jnp.float32)
    t_ref[...] = jnp.maximum(t + bneck_ref[...], 0.0).astype(t_ref.dtype)


def conv3x3_s2_neck(x_nhwc, w_eq, b_conv, w_neck_p, b_neck_p):
    """PyTorch Conv2d(k=3, stride=2, pad=1) + ReLU, fused with a neck 1x1 conv + ReLU.

    Space-to-depth turns the stride-2 3x3 conv into a stride-1 2x2 conv whose 4 taps
    are accumulated inside the kernel; batch is folded into the M dimension so the
    whole problem is a single grid step.
    """
    B, H, W, C = x_nhwc.shape
    Cout = w_eq.shape[-1]
    Dp = w_neck_p.shape[-1]
    Ho, Wo = (H - 1) // 2 + 1, (W - 1) // 2 + 1
    Hh, Wh = Ho + 2, Wo + 1            # halo so every tap slab slice stays in bounds
    Hp, Wp = 2 * Hh, 2 * Wh
    # pad=1 on top/left, zeros on bottom/right up to the even (Hp, Wp) extent
    xp = jnp.pad(x_nhwc.astype(jnp.float32),
                 ((0, 0), (1, Hp - H - 1), (1, Wp - W - 1), (0, 0)))
    # TODO(synk): do this space-to-depth rearrangement inside the kernel (strided
    # pl.ds reads of the padded NHWC ref) to avoid an extra XLA pass over the
    # activation on real-sized images.
    xs2d = (xp.reshape(B, Hh, 2, Wh, 2, C)
              .transpose(0, 1, 3, 2, 4, 5)
              .reshape(B * Hh * Wh, 4 * C))
    M = B * Hh * Wh
    Mx = _round_up(M + Wh + 1, 8)      # room for the largest tap offset (Wh + 1)
    x_flat = jnp.pad(xs2d, ((0, Mx - M), (0, 0)))

    # TODO(synk): on v7x (2 TensorCores) split M over a "parallel" grid axis once the
    # fused kernel is large enough to feed both cores; at these sizes one step wins.
    f_flat, t_flat = pl.pallas_call(
        functools.partial(_conv_neck_kernel, m_rows=M, wh=Wh),
        out_shape=(jax.ShapeDtypeStruct((M, Cout), jnp.bfloat16),
                   jax.ShapeDtypeStruct((M, Dp), jnp.bfloat16)),
        in_specs=[pl.BlockSpec(memory_space=pltpu.MemorySpace.VMEM)] * 5,
        out_specs=(pl.BlockSpec(memory_space=pltpu.MemorySpace.VMEM),
                   pl.BlockSpec(memory_space=pltpu.MemorySpace.VMEM)),
    )(x_flat, w_eq, b_conv, w_neck_p, b_neck_p)

    # Strip the halo rows/cols (tiny copies) to recover the valid spatial extents.
    f = f_flat.reshape(B, Hh, Wh, Cout)[:, :Ho, :Wo, :]
    t = t_flat.reshape(B, Hh, Wh, Dp)[:, :Ho, :Wo, :]
    return f, t


# ------------------- fused cross-attention + cls/reg head GEMM --------------------

def _attn_head_kernel(q_ref, kv_ref, wh_ref, bh_ref, o_ref, *, scale):
    kv = kv_ref[...]                                          # (B, Nt, Dp) bf16
    b, nt, dp = kv.shape
    nq = q_ref.shape[0]
    # Queries are shared across the batch: broadcast inside the kernel.
    q = jnp.broadcast_to(q_ref[...][None], (b, nq, dp))
    s = jnp.einsum("bqd,btd->bqt", q, kv,
                   preferred_element_type=jnp.float32) * scale
    m = jnp.max(s, axis=-1, keepdims=True)
    p = jnp.exp(s - m)
    denom = jnp.sum(p, axis=-1, keepdims=True)
    p = p * pl.reciprocal(denom, approx=True)                 # EUP slot
    ctx = jnp.einsum("bqt,btd->bqd", p.astype(kv.dtype), kv,
                     preferred_element_type=jnp.float32)      # (B, Nq, Dp) f32
    # Fused cls/reg head: single lane-dense GEMM, no extra launch / pad / slice.
    out = jnp.dot(ctx.reshape(b * nq, dp).astype(jnp.bfloat16), wh_ref[...],
                  preferred_element_type=jnp.float32) + bh_ref[...]
    o_ref[...] = out.astype(o_ref.dtype)


def attention_head(q_p, tokens, w_head_p, b_head_p, d_model):
    """Softmax cross-attention over all tokens fused with the cls/reg linears.

    Whole batch in one grid step (everything fits VMEM at these sizes).
    """
    B, Nt, Dp = tokens.shape
    Nq = q_p.shape[0]
    Np = w_head_p.shape[-1]
    # TODO(synk): add a kv-tile grid axis with online softmax (flash pattern) before
    # token counts grow to real SparseBEV sizes (thousands of tokens x cameras).
    out = pl.pallas_call(
        functools.partial(_attn_head_kernel, scale=1.0 / math.sqrt(d_model)),
        out_shape=jax.ShapeDtypeStruct((B * Nq, Np), jnp.bfloat16),
        in_specs=[pl.BlockSpec(memory_space=pltpu.MemorySpace.VMEM)] * 4,
        out_specs=pl.BlockSpec(memory_space=pltpu.MemorySpace.VMEM),
    )(q_p, tokens, w_head_p, b_head_p)
    return out.reshape(B, Nq, Np)


# ----------------------------- parameter preparation ------------------------------
# All weight-side preprocessing happens ONCE here, not per forward.

def prepare_params(params):
    def conv_eq(w_oihw):
        cout, cin, _, _ = w_oihw.shape
        w_hwio = jnp.transpose(w_oihw, (2, 3, 1, 0))                  # (3,3,Cin,Cout)
        w_pad = jnp.pad(w_hwio, ((0, 1), (0, 1), (0, 0), (0, 0)))     # (4,4,Cin,Cout)
        # equivalent stride-1 2x2 conv taps on space-to-depth channels (pr, pc, ci)
        w_eq = (w_pad.reshape(2, 2, 2, 2, cin, cout)
                     .transpose(0, 2, 1, 3, 4, 5)                     # (dh,dw,pr,pc,ci,co)
                     .reshape(4, 4 * cin, cout))
        return w_eq.astype(jnp.bfloat16)

    def pad_neck(w, b):
        k, n = w.shape
        wp = jnp.pad(w, ((0, 0), (0, LANE - n))).astype(jnp.bfloat16)
        bp = jnp.pad(b.reshape(1, n), ((0, 0), (0, LANE - n))).astype(jnp.float32)
        return wp, bp

    nk1_w, nk1_b = pad_neck(params["nk1_w"], params["nk1_b"])
    nk2_w, nk2_b = pad_neck(params["nk2_w"], params["nk2_b"])

    # Fused head weights: concat cls/reg, zero-pad K to the lane-dense Dp and N to 128.
    w_cat = jnp.concatenate([params["cls_w"], params["reg_w"]], axis=1)   # (D, 20)
    b_cat = jnp.concatenate([params["cls_b"], params["reg_b"]], axis=0)   # (20,)
    d, n_out = w_cat.shape
    n_pad = _round_up(n_out, LANE)
    w_head = jnp.pad(w_cat, ((0, LANE - d), (0, n_pad - n_out))).astype(jnp.bfloat16)
    b_head = jnp.pad(b_cat.reshape(1, n_out),
                     ((0, 0), (0, n_pad - n_out))).astype(jnp.float32)
    query_p = jnp.pad(params["query"],
                      ((0, 0), (0, LANE - d))).astype(jnp.bfloat16)

    return {
        "w_eq1": conv_eq(params["bb1_w"]),
        "b1": params["bb1_b"].reshape(1, -1).astype(jnp.float32),
        "w_eq2": conv_eq(params["bb2_w"]),
        "b2": params["bb2_b"].reshape(1, -1).astype(jnp.float32),
        "nk1_w": nk1_w, "nk1_b": nk1_b,
        "nk2_w": nk2_w, "nk2_b": nk2_b,
        "query": query_p,
        "w_head": w_head, "b_head": b_head,
    }


# --------------------------------- model forward ----------------------------------

def sparse_bev_oe_forward(prep, img_nchw, *, n_cls, n_reg, d_model,
                          compiler_model=True):
    # PyTorch boundary is NCHW; convert once and stay channels-last (NHWC).
    x = jnp.transpose(img_nchw, (0, 2, 3, 1))
    B = x.shape[0]

    # extract_feat: backbone stage 1 fused with neck level 1 (single launch)
    f1, t1 = conv3x3_s2_neck(x, prep["w_eq1"], prep["b1"],
                             prep["nk1_w"], prep["nk1_b"])
    # backbone stage 2 fused with neck level 2 (its raw feature map is unused here)
    _, t2 = conv3x3_s2_neck(f1, prep["w_eq2"], prep["b2"],
                            prep["nk2_w"], prep["nk2_b"])

    # head: learned queries cross-attend the multi-scale tokens; cls/reg fused in-kernel
    tokens = jnp.concatenate(
        [t1.reshape(B, -1, t1.shape[-1]), t2.reshape(B, -1, t2.shape[-1])], axis=1)
    out = attention_head(prep["query"], tokens, prep["w_head"], prep["b_head"],
                         d_model)

    model_outs = {
        "classification": out[..., :n_cls].astype(jnp.float32),
        "prediction": out[..., n_cls:n_cls + n_reg].astype(jnp.float32),
    }
    if compiler_model:
        return model_outs
    # TODO(synk): head.post_process / head.loss / depth_branch branches of
    # SparseBEVOE._post_process are training/eval-only and are not implemented here.
    return model_outs


# ------------------------------- pure-JAX reference -------------------------------
# Same bf16 operand casts / f32 accumulation as the kernels so the comparison
# isolates the Pallas implementation.

def sparse_bev_oe_reference(params, img_nchw):
    x = jnp.transpose(img_nchw, (0, 2, 3, 1))

    def conv(x_in, w_oihw, b):
        y = jax.lax.conv_general_dilated(
            x_in.astype(jnp.bfloat16),
            jnp.transpose(w_oihw, (2, 3, 1, 0)).astype(jnp.bfloat16),
            window_strides=(2, 2), padding=((1, 1), (1, 1)),
            dimension_numbers=("NHWC", "HWIO", "NHWC"),
            preferred_element_type=jnp.float32)
        return jnp.maximum(y + b.reshape(1, 1, 1, -1), 0.0)

    f1 = conv(x, params["bb1_w"], params["bb1_b"])
    f2 = conv(f1.astype(jnp.bfloat16).astype(jnp.float32),   # mirror bf16 feature store
              params["bb2_w"], params["bb2_b"])

    def neck(f, w, b):
        bsz, h, w_, c = f.shape
        y = jnp.dot(f.reshape(-1, c).astype(jnp.bfloat16), w.astype(jnp.bfloat16),
                    preferred_element_type=jnp.float32) + b
        return jnp.maximum(y, 0.0).reshape(bsz, h * w_, -1)

    t1 = neck(f1, params["nk1_w"], params["nk1_b"])
    t2 = neck(f2, params["nk2_w"], params["nk2_b"])
    tokens = jnp.concatenate([t1, t2], axis=1).astype(jnp.bfloat16)  # mirror bf16 store

    q = params["query"].astype(jnp.bfloat16)
    d = q.shape[-1]
    s = jnp.einsum("qd,btd->bqt", q, tokens,
                   preferred_element_type=jnp.float32) / math.sqrt(d)
    p = jax.nn.softmax(s, axis=-1)
    ctx = jnp.einsum("bqt,btd->bqd", p.astype(jnp.bfloat16), tokens,
                     preferred_element_type=jnp.float32)

    bsz, nq, _ = ctx.shape
    w_cat = jnp.concatenate([params["cls_w"], params["reg_w"]], axis=1)
    b_cat = jnp.concatenate([params["cls_b"], params["reg_b"]], axis=0)
    out = jnp.dot(ctx.reshape(-1, d).astype(jnp.bfloat16), w_cat.astype(jnp.bfloat16),
                  preferred_element_type=jnp.float32) + b_cat
    n_cls = params["cls_w"].shape[1]
    return {
        "classification": out[:, :n_cls].reshape(bsz, nq, -1),
        "prediction": out[:, n_cls:].reshape(bsz, nq, -1),
    }


# -------------------------------- parameter init ----------------------------------

def init_params(key):
    C_IN, C1, C2, D, NQ, NCLS, NBOX = 4, 32, 64, 32, 8, 10, 10
    ks = jax.random.split(key, 11)
    s = 0.1
    return {
        "bb1_w": s * jax.random.normal(ks[0], (C1, C_IN, 3, 3), jnp.float32),
        "bb1_b": s * jax.random.normal(ks[1], (C1,), jnp.float32),
        "bb2_w": s * jax.random.normal(ks[2], (C2, C1, 3, 3), jnp.float32),
        "bb2_b": s * jax.random.normal(ks[3], (C2,), jnp.float32),
        "nk1_w": s * jax.random.normal(ks[4], (C1, D), jnp.float32),
        "nk1_b": jnp.zeros((D,), jnp.float32),
        "nk2_w": s * jax.random.normal(ks[5], (C2, D), jnp.float32),
        "nk2_b": jnp.zeros((D,), jnp.float32),
        "query": s * jax.random.normal(ks[6], (NQ, D), jnp.float32),
        "cls_w": s * jax.random.normal(ks[7], (D, NCLS), jnp.float32),
        "cls_b": jnp.zeros((NCLS,), jnp.float32),
        "reg_w": s * jax.random.normal(ks[8], (D, NBOX), jnp.float32),
        "reg_b": jnp.zeros((NBOX,), jnp.float32),
    }


# -------------------------------------- main ---------------------------------------

if __name__ == "__main__":
    key = jax.random.PRNGKey(0)
    pkey, ikey = jax.random.split(key)
    params = init_params(pkey)
    prep = prepare_params(params)     # hoisted: weight packing/padding done once
    img = jax.random.normal(ikey, (2, 4, 16, 16), jnp.float32)   # NCHW boundary

    n_cls = params["cls_w"].shape[1]
    n_reg = params["reg_w"].shape[1]
    d_model = params["query"].shape[1]

    fwd = jax.jit(functools.partial(
        sparse_bev_oe_forward, n_cls=n_cls, n_reg=n_reg, d_model=d_model,
        compiler_model=True))
    outs = fwd(prep, img)
    outs = jax.tree_util.tree_map(jax.block_until_ready, outs)

    ref = sparse_bev_oe_reference(params, img)
    for name in ("classification", "prediction"):
        assert outs[name].shape == ref[name].shape, (name, outs[name].shape,
                                                     ref[name].shape)
        err = float(jnp.max(jnp.abs(outs[name].astype(jnp.float32) - ref[name])))
        assert err < 1e-2, f"{name} mismatch: {err}"

    print("KERNEL_OK")
</pallas_src>

<mosaic_0001>
module attributes {stable_mosaic.version = 11 : i64} {
  func.func @_conv_neck_kernel(%arg0: memref<192x16xf32, #tpu.memory_space<vmem>>, %arg1: memref<4x16x32xbf16, #tpu.memory_space<vmem>>, %arg2: memref<1x32xf32, #tpu.memory_space<vmem>>, %arg3: memref<32x128xbf16, #tpu.memory_space<vmem>>, %arg4: memref<1x128xf32, #tpu.memory_space<vmem>>, %arg5: memref<180x32xbf16, #tpu.memory_space<vmem>>, %arg6: memref<180x128xbf16, #tpu.memory_space<vmem>>) attributes {dimension_semantics = [], scalar_prefetch = 0 : i64, scratch_operands = 0 : i64, tpu.core_type = #tpu.core_type<tc>} {
    %cst = arith.constant 0.000000e+00 : f32
    %0 = vector.broadcast %cst : f32 to vector<180x32xf32>
    %c0 = arith.constant 0 : index
    %c0_0 = arith.constant 0 : index
    %1 = vector.load %arg0[%c0, %c0_0] : memref<192x16xf32, #tpu.memory_space<vmem>>, vector<180x16xf32>
    %2 = arith.truncf %1 : vector<180x16xf32> to vector<180x16xbf16>
    %c0_1 = arith.constant 0 : index
    %c0_2 = arith.constant 0 : index
    %c0_3 = arith.constant 0 : index
    %3 = vector.load %arg1[%c0_1, %c0_2, %c0_3] : memref<4x16x32xbf16, #tpu.memory_space<vmem>>, vector<1x16x32xbf16>
    %4 = vector.shape_cast %3 : vector<1x16x32xbf16> to vector<16x32xbf16>
    %cst_4 = arith.constant dense<0.000000e+00> : vector<180x32xf32>
    %5 = tpu.matmul %2, %4, %cst_4 {dimension_numbers = #tpu.dot_dimension_numbers<[1], [0], [0], [1], [0, 0, 1, 1], [], []>} : vector<180x16xbf16>, vector<16x32xbf16>, vector<180x32xf32> -> vector<180x32xf32>
    %6 = arith.addf %0, %5 : vector<180x32xf32>
    %c1 = arith.constant 1 : index
    %c0_5 = arith.constant 0 : index
    %7 = vector.load %arg0[%c1, %c0_5] : memref<192x16xf32, #tpu.memory_space<vmem>>, vector<180x16xf32>
    %8 = arith.truncf %7 : vector<180x16xf32> to vector<180x16xbf16>
    %c1_6 = arith.constant 1 : index
    %c0_7 = arith.constant 0 : index
    %c0_8 = arith.constant 0 : index
    %9 = vector.load %arg1[%c1_6, %c0_7, %c0_8] : memref<4x16x32xbf16, #tpu.memory_space<vmem>>, vector<1x16x32xbf16>
    %10 = vector.shape_cast %9 : vector<1x16x32xbf16> to vector<16x32xbf16>
    %cst_9 = arith.constant dense<0.000000e+00> : vector<180x32xf32>
    %11 = tpu.matmul %8, %10, %cst_9 {dimension_numbers = #tpu.dot_dimension_numbers<[1], [0], [0], [1], [0, 0, 1, 1], [], []>} : vector<180x16xbf16>, vector<16x32xbf16>, vector<180x32xf32> -> vector<180x32xf32>
    %12 = arith.addf %6, %11 : vector<180x32xf32>
    %c9 = arith.constant 9 : index
    %c0_10 = arith.constant 0 : index
    %13 = vector.load %arg0[%c9, %c0_10] : memref<192x16xf32, #tpu.memory_space<vmem>>, vector<180x16xf32>
    %14 = arith.truncf %13 : vector<180x16xf32> to vector<180x16xbf16>
    %c2 = arith.constant 2 : index
    %c0_11 = arith.constant 0 : index
    %c0_12 = arith.constant 0 : index
    %15 = vector.load %arg1[%c2, %c0_11, %c0_12] : memref<4x16x32xbf16, #tpu.memory_space<vmem>>, vector<1x16x32xbf16>
    %16 = vector.shape_cast %15 : vector<1x16x32xbf16> to vector<16x32xbf16>
    %cst_13 = arith.constant dense<0.000000e+00> : vector<180x32xf32>
    %17 = tpu.matmul %14, %16, %cst_13 {dimension_numbers = #tpu.dot_dimension_numbers<[1], [0], [0], [1], [0, 0, 1, 1], [], []>} : vector<180x16xbf16>, vector<16x32xbf16>, vector<180x32xf32> -> vector<180x32xf32>
    %18 = arith.addf %12, %17 : vector<180x32xf32>
    %c10 = arith.constant 10 : index
    %c0_14 = arith.constant 0 : index
    %19 = vector.load %arg0[%c10, %c0_14] : memref<192x16xf32, #tpu.memory_space<vmem>>, vector<180x16xf32>
    %20 = arith.truncf %19 : vector<180x16xf32> to vector<180x16xbf16>
    %c3 = arith.constant 3 : index
    %c0_15 = arith.constant 0 : index
    %c0_16 = arith.constant 0 : index
    %21 = vector.load %arg1[%c3, %c0_15, %c0_16] : memref<4x16x32xbf16, #tpu.memory_space<vmem>>, vector<1x16x32xbf16>
    %22 = vector.shape_cast %21 : vector<1x16x32xbf16> to vector<16x32xbf16>
    %cst_17 = arith.constant dense<0.000000e+00> : vector<180x32xf32>
    %23 = tpu.matmul %20, %22, %cst_17 {dimension_numbers = #tpu.dot_dimension_numbers<[1], [0], [0], [1], [0, 0, 1, 1], [], []>} : vector<180x16xbf16>, vector<16x32xbf16>, vector<180x32xf32> -> vector<180x32xf32>
    %24 = arith.addf %18, %23 : vector<180x32xf32>
    %c0_18 = arith.constant 0 : index
    %c0_19 = arith.constant 0 : index
    %25 = vector.load %arg2[%c0_18, %c0_19] : memref<1x32xf32, #tpu.memory_space<vmem>>, vector<1x32xf32>
    %26 = vector.broadcast %25 : vector<1x32xf32> to vector<180x32xf32>
    %27 = arith.addf %24, %26 : vector<180x32xf32>
    %cst_20 = arith.constant 0.000000e+00 : f32
    %28 = vector.broadcast %cst_20 : f32 to vector<180x32xf32>
    %29 = arith.maximumf %27, %28 : vector<180x32xf32>
    %30 = arith.truncf %29 : vector<180x32xf32> to vector<180x32xbf16>
    %c0_21 = arith.constant 0 : index
    %c0_22 = arith.constant 0 : index
    %31 = vector.load %arg5[%c0_21, %c0_22] : memref<180x32xbf16, #tpu.memory_space<vmem>>, vector<180x32xbf16>
    tpu.vector_store %arg5[%c0_21, %c0_22], %30 {strides = array<i32>} : memref<180x32xbf16, #tpu.memory_space<vmem>>, vector<180x32xbf16>,
    %32 = arith.truncf %29 : vector<180x32xf32> to vector<180x32xbf16>
    %c0_23 = arith.constant 0 : index
    %c0_24 = arith.constant 0 : index
    %33 = vector.load %arg3[%c0_23, %c0_24] : memref<32x128xbf16, #tpu.memory_space<vmem>>, vector<32x128xbf16>
    %cst_25 = arith.constant dense<0.000000e+00> : vector<180x128xf32>
    %34 = tpu.matmul %32, %33, %cst_25 {dimension_numbers = #tpu.dot_dimension_numbers<[1], [0], [0], [1], [0, 0, 1, 1], [], []>} : vector<180x32xbf16>, vector<32x128xbf16>, vector<180x128xf32> -> vector<180x128xf32>
    %c0_26 = arith.constant 0 : index
    %c0_27 = arith.constant 0 : index
    %35 = vector.load %arg4[%c0_26, %c0_27] : memref<1x128xf32, #tpu.memory_space<vmem>>, vector<1x128xf32>
    %36 = vector.broadcast %35 : vector<1x128xf32> to vector<180x128xf32>
    %37 = arith.addf %34, %36 : vector<180x128xf32>
    %cst_28 = arith.constant 0.000000e+00 : f32
    %38 = vector.broadcast %cst_28 : f32 to vector<180x128xf32>
    %39 = arith.maximumf %37, %38 : vector<180x128xf32>
    %40 = arith.truncf %39 : vector<180x128xf32> to vector<180x128xbf16>
    %c0_29 = arith.constant 0 : index
    %c0_30 = arith.constant 0 : index
    %41 = vector.load %arg6[%c0_29, %c0_30] : memref<180x128xbf16, #tpu.memory_space<vmem>>, vector<180x128xbf16>
    tpu.vector_store %arg6[%c0_29, %c0_30], %40 {strides = array<i32>} : memref<180x128xbf16, #tpu.memory_space<vmem>>, vector<180x128xbf16>,
    return
  }
}

module attributes {stable_mosaic.version = 11 : i64} {
  func.func @_conv_neck_kernel(%arg0: memref<72x128xf32, #tpu.memory_space<vmem>>, %arg1: memref<4x128x64xbf16, #tpu.memory_space<vmem>>, %arg2: memref<1x64xf32, #tpu.memory_space<vmem>>, %arg3: memref<64x128xbf16, #tpu.memory_space<vmem>>, %arg4: memref<1x128xf32, #tpu.memory_space<vmem>>, %arg5: memref<60x64xbf16, #tpu.memory_space<vmem>>, %arg6: memref<60x128xbf16, #tpu.memory_space<vmem>>) attributes {dimension_semantics = [], scalar_prefetch = 0 : i64, scratch_operands = 0 : i64, tpu.core_type = #tpu.core_type<tc>} {
    %cst = arith.constant 0.000000e+00 : f32
    %0 = vector.broadcast %cst : f32 to vector<60x64xf32>
    %c0 = arith.constant 0 : index
    %c0_0 = arith.constant 0 : index
    %1 = vector.load %arg0[%c0, %c0_0] : memref<72x128xf32, #tpu.memory_space<vmem>>, vector<60x128xf32>
    %2 = arith.truncf %1 : vector<60x128xf32> to vector<60x128xbf16>
    %c0_1 = arith.constant 0 : index
    %c0_2 = arith.constant 0 : index
    %c0_3 = arith.constant 0 : index
    %3 = vector.load %arg1[%c0_1, %c0_2, %c0_3] : memref<4x128x64xbf16, #tpu.memory_space<vmem>>, vector<1x128x64xbf16>
    %4 = vector.shape_cast %3 : vector<1x128x64xbf16> to vector<128x64xbf16>
    %cst_4 = arith.constant dense<0.000000e+00> : vector<60x64xf32>
    %5 = tpu.matmul %2, %4, %cst_4 {dimension_numbers = #tpu.dot_dimension_numbers<[1], [0], [0], [1], [0, 0, 1, 1], [], []>} : vector<60x128xbf16>, vector<128x64xbf16>, vector<60x64xf32> -> vector<60x64xf32>
    %6 = arith.addf %0, %5 : vector<60x64xf32>
    %c1 = arith.constant 1 : index
    %c0_5 = arith.constant 0 : index
    %7 = vector.load %arg0[%c1, %c0_5] : memref<72x128xf32, #tpu.memory_space<vmem>>, vector<60x128xf32>
    %8 = arith.truncf %7 : vector<60x128xf32> to vector<60x128xbf16>
    %c1_6 = arith.constant 1 : index
    %c0_7 = arith.constant 0 : index
    %c0_8 = arith.constant 0 : index
    %9 = vector.load %arg1[%c1_6, %c0_7, %c0_8] : memref<4x128x64xbf16, #tpu.memory_space<vmem>>, vector<1x128x64xbf16>
    %10 = vector.shape_cast %9 : vector<1x128x64xbf16> to vector<128x64xbf16>
    %cst_9 = arith.constant dense<0.000000e+00> : vector<60x64xf32>
    %11 = tpu.matmul %8, %10, %cst_9 {dimension_numbers = #tpu.dot_dimension_numbers<[1], [0], [0], [1], [0, 0, 1, 1], [], []>} : vector<60x128xbf16>, vector<128x64xbf16>, vector<60x64xf32> -> vector<60x64xf32>
    %12 = arith.addf %6, %11 : vector<60x64xf32>
    %c5 = arith.constant 5 : index
    %c0_10 = arith.constant 0 : index
    %13 = vector.load %arg0[%c5, %c0_10] : memref<72x128xf32, #tpu.memory_space<vmem>>, vector<60x128xf32>
    %14 = arith.truncf %13 : vector<60x128xf32> to vector<60x128xbf16>
    %c2 = arith.constant 2 : index
    %c0_11 = arith.constant 0 : index
    %c0_12 = arith.constant 0 : index
    %15 = vector.load %arg1[%c2, %c0_11, %c0_12] : memref<4x128x64xbf16, #tpu.memory_space<vmem>>, vector<1x128x64xbf16>
    %16 = vector.shape_cast %15 : vector<1x128x64xbf16> to vector<128x64xbf16>
    %cst_13 = arith.constant dense<0.000000e+00> : vector<60x64xf32>
    %17 = tpu.matmul %14, %16, %cst_13 {dimension_numbers = #tpu.dot_dimension_numbers<[1], [0], [0], [1], [0, 0, 1, 1], [], []>} : vector<60x128xbf16>, vector<128x64xbf16>, vector<60x64xf32> -> vector<60x64xf32>
    %18 = arith.addf %12, %17 : vector<60x64xf32>
    %c6 = arith.constant 6 : index
    %c0_14 = arith.constant 0 : index
    %19 = vector.load %arg0[%c6, %c0_14] : memref<72x128xf32, #tpu.memory_space<vmem>>, vector<60x128xf32>
    %20 = arith.truncf %19 : vector<60x128xf32> to vector<60x128xbf16>
    %c3 = arith.constant 3 : index
    %c0_15 = arith.constant 0 : index
    %c0_16 = arith.constant 0 : index
    %21 = vector.load %arg1[%c3, %c0_15, %c0_16] : memref<4x128x64xbf16, #tpu.memory_space<vmem>>, vector<1x128x64xbf16>
    %22 = vector.shape_cast %21 : vector<1x128x64xbf16> to vector<128x64xbf16>
    %cst_17 = arith.constant dense<0.000000e+00> : vector<60x64xf32>
    %23 = tpu.matmul %20, %22, %cst_17 {dimension_numbers = #tpu.dot_dimension_numbers<[1], [0], [0], [1], [0, 0, 1, 1], [], []>} : vector<60x128xbf16>, vector<128x64xbf16>, vector<60x64xf32> -> vector<60x64xf32>
    %24 = arith.addf %18, %23 : vector<60x64xf32>
    %c0_18 = arith.constant 0 : index
    %c0_19 = arith.constant 0 : index
    %25 = vector.load %arg2[%c0_18, %c0_19] : memref<1x64xf32, #tpu.memory_space<vmem>>, vector<1x64xf32>
    %26 = vector.broadcast %25 : vector<1x64xf32> to vector<60x64xf32>
    %27 = arith.addf %24, %26 : vector<60x64xf32>
    %cst_20 = arith.constant 0.000000e+00 : f32
    %28 = vector.broadcast %cst_20 : f32 to vector<60x64xf32>
    %29 = arith.maximumf %27, %28 : vector<60x64xf32>
    %30 = arith.truncf %29 : vector<60x64xf32> to vector<60x64xbf16>
    %c0_21 = arith.constant 0 : index
    %c0_22 = arith.constant 0 : index
    %31 = vector.load %arg5[%c0_21, %c0_22] : memref<60x64xbf16, #tpu.memory_space<vmem>>, vector<60x64xbf16>
    tpu.vector_store %arg5[%c0_21, %c0_22], %30 {strides = array<i32>} : memref<60x64xbf16, #tpu.memory_space<vmem>>, vector<60x64xbf16>,
    %32 = arith.truncf %29 : vector<60x64xf32> to vector<60x64xbf16>
    %c0_23 = arith.constant 0 : index
    %c0_24 = arith.constant 0 : index
    %33 = vector.load %arg3[%c0_23, %c0_24] : memref<64x128xbf16, #tpu.memory_space<vmem>>, vector<64x128xbf16>
    %cst_25 = arith.constant dense<0.000000e+00> : vector<60x128xf32>
    %34 = tpu.matmul %32, %33, %cst_25 {dimension_numbers = #tpu.dot_dimension_numbers<[1], [0], [0], [1], [0, 0, 1, 1], [], []>} : vector<60x64xbf16>, vector<64x128xbf16>, vector<60x128xf32> -> vector<60x128xf32>
    %c0_26 = arith.constant 0 : index
    %c0_27 = arith.constant 0 : index
    %35 = vector.load %arg4[%c0_26, %c0_27] : memref<1x128xf32, #tpu.memory_space<vmem>>, vector<1x128xf32>
    %36 = vector.broadcast %35 : vector<1x128xf32> to vector<60x128xf32>
    %37 = arith.addf %34, %36 : vector<60x128xf32>
    %cst_28 = arith.constant 0.000000e+00 : f32
    %38 = vector.broadcast %cst_28 : f32 to vector<60x128xf32>
    %39 = arith.maximumf %37, %38 : vector<60x128xf32>
    %40 = arith.truncf %39 : vector<60x128xf32> to vector<60x128xbf16>
    %c0_29 = arith.constant 0 : index
    %c0_30 = arith.constant 0 : index
    %41 = vector.load %arg6[%c0_29, %c0_30] : memref<60x128xbf16, #tpu.memory_space<vmem>>, vector<60x128xbf16>
    tpu.vector_store %arg6[%c0_29, %c0_30], %40 {strides = array<i32>} : memref<60x128xbf16, #tpu.memory_space<vmem>>, vector<60x128xbf16>,
    return
  }
}

module attributes {stable_mosaic.version = 11 : i64} {
  func.func @_attn_head_kernel(%arg0: memref<8x128xbf16, #tpu.memory_space<vmem>>, %arg1: memref<2x80x128xbf16, #tpu.memory_space<vmem>>, %arg2: memref<128x128xbf16, #tpu.memory_space<vmem>>, %arg3: memref<1x128xf32, #tpu.memory_space<vmem>>, %arg4: memref<16x128xbf16, #tpu.memory_space<vmem>>) attributes {dimension_semantics = [], scalar_prefetch = 0 : i64, scratch_operands = 0 : i64, tpu.core_type = #tpu.core_type<tc>} {
    %c0 = arith.constant 0 : index
    %c0_0 = arith.constant 0 : index
    %c0_1 = arith.constant 0 : index
    %0 = vector.load %arg1[%c0, %c0_0, %c0_1] : memref<2x80x128xbf16, #tpu.memory_space<vmem>>, vector<2x80x128xbf16>
    %c0_2 = arith.constant 0 : index
    %c0_3 = arith.constant 0 : index
    %1 = vector.load %arg0[%c0_2, %c0_3] : memref<8x128xbf16, #tpu.memory_space<vmem>>, vector<8x128xbf16>
    %2 = vector.shape_cast %1 : vector<8x128xbf16> to vector<1x8x128xbf16>
    %3 = vector.shape_cast %2 : vector<1x8x128xbf16> to vector<1x8x128xbf16>
    %4 = vector.broadcast %3 : vector<1x8x128xbf16> to vector<2x8x128xbf16>
    "tpu.trace_start"() <{level = 10 : i32, message = "bqd,btd->bqt"}> : () -> ()
    %cst = arith.constant dense<0.000000e+00> : vector<2x8x80xf32>
    %5 = tpu.matmul %4, %0, %cst {dimension_numbers = #tpu.dot_dimension_numbers<[2], [2], [1], [1], [0, 0, 0, 1, 1, 1], [0], [0]>} : vector<2x8x128xbf16>, vector<2x80x128xbf16>, vector<2x8x80xf32> -> vector<2x8x80xf32>
    "tpu.trace_stop"() : () -> ()
    %cst_4 = arith.constant 0.176776692 : f32
    %6 = vector.broadcast %cst_4 : f32 to vector<2x8x80xf32>
    %7 = arith.mulf %5, %6 : vector<2x8x80xf32>
    %cst_5 = arith.constant dense<0xFF800000> : vector<2x8xf32>
    %8 = vector.multi_reduction <maximumf>, %7, %cst_5 [2] : vector<2x8x80xf32> to vector<2x8xf32>
    %9 = vector.shape_cast %8 : vector<2x8xf32> to vector<2x8x1xf32>
    %10 = vector.broadcast %9 : vector<2x8x1xf32> to vector<2x8x80xf32>
    %11 = arith.subf %7, %10 : vector<2x8x80xf32>
    %12 = math.exp %11 : vector<2x8x80xf32>
    %cst_6 = arith.constant dense<0.000000e+00> : vector<2x8xf32>
    %13 = vector.multi_reduction <add>, %12, %cst_6 [2] : vector<2x8x80xf32> to vector<2x8xf32>
    %14 = vector.shape_cast %13 : vector<2x8xf32> to vector<2x8x1xf32>
    %15 = tpu.reciprocal %14 {approx = true} : vector<2x8x1xf32> -> vector<2x8x1xf32>
    %16 = vector.broadcast %15 : vector<2x8x1xf32> to vector<2x8x80xf32>
    %17 = arith.mulf %12, %16 : vector<2x8x80xf32>
    %18 = arith.truncf %17 : vector<2x8x80xf32> to vector<2x8x80xbf16>
    "tpu.trace_start"() <{level = 10 : i32, message = "bqt,btd->bqd"}> : () -> ()
    %cst_7 = arith.constant dense<0.000000e+00> : vector<2x8x128xf32>
    %19 = tpu.matmul %18, %0, %cst_7 {dimension_numbers = #tpu.dot_dimension_numbers<[2], [1], [1], [2], [0, 0, 0, 1, 1, 2], [0], [0]>} : vector<2x8x80xbf16>, vector<2x80x128xbf16>, vector<2x8x128xf32> -> vector<2x8x128xf32>
    "tpu.trace_stop"() : () -> ()
    %20 = vector.shape_cast %19 : vector<2x8x128xf32> to vector<16x128xf32>
    %21 = arith.truncf %20 : vector<16x128xf32> to vector<16x128xbf16>
    %c0_8 = arith.constant 0 : index
    %c0_9 = arith.constant 0 : index
    %22 = vector.load %arg2[%c0_8, %c0_9] : memref<128x128xbf16, #tpu.memory_space<vmem>>, vector<128x128xbf16>
    %cst_10 = arith.constant dense<0.000000e+00> : vector<16x128xf32>
    %23 = tpu.matmul %21, %22, %cst_10 {dimension_numbers = #tpu.dot_dimension_numbers<[1], [0], [0], [1], [0, 0, 1, 1], [], []>} : vector<16x128xbf16>, vector<128x128xbf16>, vector<16x128xf32> -> vector<16x128xf32>
    %c0_11 = arith.constant 0 : index
    %c0_12 = arith.constant 0 : index
    %24 = vector.load %arg3[%c0_11, %c0_12] : memref<1x128xf32, #tpu.memory_space<vmem>>, vector<1x128xf32>
    %25 = vector.broadcast %24 : vector<1x128xf32> to vector<16x128xf32>
    %26 = arith.addf %23, %25 : vector<16x128xf32>
    %27 = arith.truncf %26 : vector<16x128xf32> to vector<16x128xbf16>
    %c0_13 = arith.constant 0 : index
    %c0_14 = arith.constant 0 : index
    %28 = vector.load %arg4[%c0_13, %c0_14] : memref<16x128xbf16, #tpu.memory_space<vmem>>, vector<16x128xbf16>
    tpu.vector_store %arg4[%c0_13, %c0_14], %27 {strides = array<i32>} : memref<16x128xbf16, #tpu.memory_space<vmem>>, vector<16x128xbf16>,
    return
  }
}

</mosaic_0001>

<bundles_post_ra>
// kernel: sparse_bev_oe_forward.3
= control target key start
LH: loop header
LB: loop body
LE: loop exit
PB: predicated region body
PF: predicated region fallthrough
CT: control target
= control target key end

     0   :  { %vm104_vm0 = vcmask 130048   ;;  %vm1047_vm1 = vcmask 257024   ;;  %vm1095_vm2 = vcmask 261120   ;;  %vm1070_vm3 = vcmask 254976   ;;  %s2475_s1 = inlined_call_operand.vmem [shape: bf16[4,16,32], index: 1, kind: input, shape index: {}]   ;;  %s2476_s0 = inlined_call_operand.vmem [shape: f32[192,16], index: 0, kind: input, shape index: {}]   ;;  %s2477_s3 = inlined_call_operand.vmem [shape: bf16[32,128], index: 3, kind: input, shape index: {}]   ;;  %s2478_s2 = inlined_call_operand.vmem [shape: f32[1,32], index: 2, kind: input, shape index: {}]   ;;  %s2479_s5 = inlined_call_operand.vmem [shape: bf16[180,32], index: 5, kind: output, shape index: {0}]   ;;  %s2480_s4 = inlined_call_operand.vmem [shape: f32[1,128], index: 4, kind: input, shape index: {}]   ;;  %s2481_s6 = inlined_call_operand.vmem [shape: bf16[180,128], index: 6, kind: output, shape index: {1}]  }
   0x1   :  { %v1898_v0 = vld [vmem:[%s2475_s1 + $0x8] sm:$0xff]   ;;  %v1899_v1 = vld [vmem:[%s2475_s1] sm:$0xff]   ;;  %v62_v7 = vld [vmem:[%s2476_s0 + $0x11] sm:$0xff] }
   0x2   :  { %1704 = vmatprep.subr.bf16.mxu1 %v1898_v0  ;;  %v60_v2 = vld [vmem:[%s2476_s0 + $0x1] sm:$0xff]  ;;  %v1951_v3 = vld [vmem:[%s2476_s0 + $0x9] sm:$0xff]  ;;  %1730 = vmatprep.subr.bf16.mxu0 %v1899_v1  ;;  %v1966_v8 = vld [vmem:[%s2476_s0 + $0x19] sm:$0xff] }
   0x3   :  { %v23_v4 = vld [vmem:[%s2476_s0] sm:$0xff]  ;;  %1705 = vmatpush3.bf16.msra.mxu1 %v1898_v0  ;;  %v83_v5 = vpack.c.bf16 %v1951_v3, %v60_v2  ;;  %v24_v6 = vld [vmem:[%s2476_s0 + $0x8] sm:$0xff]  ;;  %1731 = vmatpush3.bf16.msra.mxu0 %v1899_v1  ;;  %v84_v10 = vpack.c.bf16 %v1966_v8, %v62_v7  ;;  %v25_v11 = vld [vmem:[%s2476_s0 + $0x10] sm:$0xff]  ;;  %v462_v43 = vpack.c.bf16 %v62_v7, %v1951_v3 }
   0x4   :  { %v46_v9 = vpack.c.bf16 %v24_v6, %v23_v4  ;;  %v26_v12 = vld [vmem:[%s2476_s0 + $0x18] sm:$0xff]  ;;  %1836 = vmatprep.subr.bf16.mxu1 %v1899_v1  ;;  %v1900_v14 = vld [vmem:[%s2475_s1 + $0x10] sm:$0xff]   ;;  %v64_v15 = vld [vmem:[%s2476_s0 + $0x21] sm:$0xff] }
   0x5   :  { %1706 = vmatprep.mubr.msk.bf16.mxu1 %vm104_vm0, %v83_v5  ;;  %v47_v13 = vpack.c.bf16 %v26_v12, %v25_v11  ;;  %v65_v16 = vld [vmem:[%s2476_s0 + $0x29] sm:$0xff]  ;;  %v27_v17 = vld [vmem:[%s2476_s0 + $0x20] sm:$0xff]  ;;  %1756 = vmatprep.subr.bf16.mxu0 %v1900_v14  ;;  %v66_v21 = vld [vmem:[%s2476_s0 + $0x31] sm:$0xff]  ;;  %v463_v49 = vpack.c.bf16 %v64_v15, %v1966_v8 }
   0x6   :  { %1732 = vmatprep.mubr.msk.bf16.mxu0 %vm104_vm0, %v46_v9  ;;  %1707 = vmatmul.mubr.msk.bf16.vlgmr.msra.gmra.mrb[0].mxu1 %vm104_vm0, %v84_v10  ;;  %v28_v18 = vld [vmem:[%s2476_s0 + $0x28] sm:$0xff]  ;;  %v85_v19 = vpack.c.bf16 %v65_v16, %v64_v15  ;;  %v67_v22 = vld [vmem:[%s2476_s0 + $0x39] sm:$0xff]  ;;  %v29_v23 = vld [vmem:[%s2476_s0 + $0x30] sm:$0xff]  ;;  %v464_v51 = vpack.c.bf16 %v66_v21, %v65_v16 }
   0x7   :  { %1733 = vmatmul.mubr.msk.bf16.vlgmr.msra.gmra.mrb[0].mxu0 %vm104_vm0, %v47_v13  ;;  %v48_v20 = vpack.c.bf16 %v28_v18, %v27_v17  ;;  %v30_v24 = vld [vmem:[%s2476_s0 + $0x38] sm:$0xff]  ;;  %v68_v25 = vld [vmem:[%s2476_s0 + $0x41] sm:$0xff]  ;;  %v69_v26 = vld [vmem:[%s2476_s0 + $0x49] sm:$0xff]  ;;  %1837 = vmatpush3.bf16.msra.mxu1 %v1899_v1  ;;  %v86_v29 = vpack.c.bf16 %v67_v22, %v66_v21 }
   0x8   :  { %1757 = vmatpush3.bf16.msra.mxu0 %v1900_v14  ;;  %1710 = vmatprep.mubr.msk.bf16.mxu1 %vm104_vm0, %v85_v19  ;;  %v31_v27 = vld [vmem:[%s2476_s0 + $0x40] sm:$0xff]  ;;  %v32_v28 = vld [vmem:[%s2476_s0 + $0x48] sm:$0xff]  ;;  %v49_v30 = vpack.c.bf16 %v30_v24, %v29_v23  ;;  %v87_v31 = vpack.c.bf16 %v69_v26, %v68_v25  ;;  %v1901_v33 = vld [vmem:[%s2475_s1 + $0x18] sm:$0xff]   ;;  %v465_v57 = vpack.c.bf16 %v68_v25, %v67_v22 }
   0x9   :  { %1736 = vmatprep.mubr.msk.bf16.mxu0 %vm104_vm0, %v48_v20  ;;  %v50_v32 = vpack.c.bf16 %v32_v28, %v31_v27  ;;  %v70_v34 = vld [vmem:[%s2476_s0 + $0x51] sm:$0xff]  ;;  %v71_v35 = vld [vmem:[%s2476_s0 + $0x59] sm:$0xff]  ;;  %v72_v38 = vld [vmem:[%s2476_s0 + $0x61] sm:$0xff]  ;;  %1782 = vmatprep.subr.bf16.mxu0 %v1901_v33 }
   0xa   :  { %v33_v36 = vld [vmem:[%s2476_s0 + $0x50] sm:$0xff]  ;;  %v34_v37 = vld [vmem:[%s2476_s0 + $0x58] sm:$0xff]  ;;  %v88_v40 = vpack.c.bf16 %v71_v35, %v70_v34  ;;  %v76_v46 = vld [vmem:[%s2476_s0 + $0x81] sm:$0xff]  ;;  %v466_v59 = vpack.c.bf16 %v70_v34, %v69_v26  ;;  %v467_v0 = vpack.c.bf16 %v72_v38, %v71_v35 }
   0xb   :  { %v73_v39 = vld [vmem:[%s2476_s0 + $0x69] sm:$0xff]  ;;  %v51_v41 = vpack.c.bf16 %v34_v37, %v33_v36  ;;  %v74_v44 = vld [vmem:[%s2476_s0 + $0x71] sm:$0xff]  ;;  %v75_v45 = vld [vmem:[%s2476_s0 + $0x79] sm:$0xff] }
   0xc   :  { %v89_v42 = vpack.c.bf16 %v73_v39, %v72_v38  ;;  %v77_v47 = vld [vmem:[%s2476_s0 + $0x89] sm:$0xff]  ;;  %v90_v48 = vpack.c.bf16 %v75_v45, %v74_v44  ;;  %v78_v52 = vld [vmem:[%s2476_s0 + $0x91] sm:$0xff]  ;;  %v79_v53 = vld [vmem:[%s2476_s0 + $0x99] sm:$0xff]  ;;  %v468_v2 = vpack.c.bf16 %v74_v44, %v73_v39  ;;  %v469_v8 = vpack.c.bf16 %v76_v46, %v75_v45 }
   0xd   :  { %v91_v50 = vpack.c.bf16 %v77_v47, %v76_v46  ;;  %v80_v54 = vld [vmem:[%s2476_s0 + $0xa1] sm:$0xff]  ;;  %v81_v55 = vld [vmem:[%s2476_s0 + $0xa9] sm:$0xff]  ;;  %v92_v56 = vpack.c.bf16 %v79_v53, %v78_v52  ;;  %v82_v60 = vld [vmem:[%s2476_s0 + $0xb1] sm:$0xf]  ;;  %v470_v10 = vpack.c.bf16 %v78_v52, %v77_v47 }
   0xe   :  { %1711 = vmatmul.mubr.msk.bf16.gmra.mrb[4].mxu1 %vm104_vm0, %v86_v29  ;;  %v93_v58 = vpack.c.bf16 %v81_v55, %v80_v54  ;;  %v35_v61 = vld [vmem:[%s2476_s0 + $0x60] sm:$0xff]  ;;  %v36_v62 = vld [vmem:[%s2476_s0 + $0x68] sm:$0xff]  ;;  %v94_v63 = vpack.c.bf16 %v82_v60, %v82_v60  ;;  %v37_v3 = vld [vmem:[%s2476_s0 + $0x70] sm:$0xff]  ;;  %v471_v17 = vpack.c.bf16 %v80_v54, %v79_v53 }
   0xf   :  { %1737 = vmatmul.mubr.msk.bf16.gmra.mrb[4].mxu0 %vm104_vm0, %v49_v30  ;;  %1714 = vmatprep.mubr.msk.bf16.mxu1 %vm104_vm0, %v87_v31  ;;  %v52_v1 = vpack.c.bf16 %v36_v62, %v35_v61  ;;  %v38_v4 = vld [vmem:[%s2476_s0 + $0x78] sm:$0xff]  ;;  %v39_v5 = vld [vmem:[%s2476_s0 + $0x80] sm:$0xff]  ;;  %v40_v6 = vld [vmem:[%s2476_s0 + $0x88] sm:$0xff] }
  0x10   :  { %1740 = vmatprep.mubr.msk.bf16.mxu0 %vm104_vm0, %v50_v32  ;;  %v53_v7 = vpack.c.bf16 %v38_v4, %v37_v3  ;;  %v54_v9 = vpack.c.bf16 %v40_v6, %v39_v5  ;;  %v41_v11 = vld [vmem:[%s2476_s0 + $0x90] sm:$0xff]  ;;  %v42_v12 = vld [vmem:[%s2476_s0 + $0x98] sm:$0xff]  ;;  %v43_v13 = vld [vmem:[%s2476_s0 + $0xa0] sm:$0xff] }
  0x11   :  { %v44_v14 = vld [vmem:[%s2476_s0 + $0xa8] sm:$0xff]  ;;  %v460_v15 = vld [vmem:[%s2476_s0 + $0xb1] sm:$0xff]  ;;  %v55_v16 = vpack.c.bf16 %v42_v12, %v41_v11  ;;  %v461_v21 = vld [vmem:[%s2476_s0 + $0xb9] sm:$0xf] }
  0x12   :  { %v56_v18 = vpack.c.bf16 %v44_v14, %v43_v13  ;;  %v472_v19 = vpack.c.bf16 %v460_v15, %v81_v55  ;;  %v45_v20 = vld [vmem:[%s2476_s0 + $0xb0] sm:$0xf]  ;;  %v473_v25 = vpack.c.bf16 %v461_v21, %v461_v21  ;;  %v672_v27 = vld [vmem:[%s2476_s0 + $0x1a] sm:$0xff]  ;;  %v673_v28 = vld [vmem:[%s2476_s0 + $0x22] sm:$0xff] }
  0x13   :  { %v670_v22 = vld [vmem:[%s2476_s0 + $0xa] sm:$0xff]  ;;  %v671_v23 = vld [vmem:[%s2476_s0 + $0x12] sm:$0xff]  ;;  %v57_v24 = vpack.c.bf16 %v45_v20, %v45_v20  ;;  %v694_v31 = vpack.c.bf16 %v673_v28, %v672_v27  ;;  %v677_v34 = vld [vmem:[%s2476_s0 + $0x42] sm:$0xff] }
  0x14   :  { %v693_v26 = vpack.c.bf16 %v671_v23, %v670_v22  ;;  %v674_v29 = vld [vmem:[%s2476_s0 + $0x2a] sm:$0xff]  ;;  %v675_v30 = vld [vmem:[%s2476_s0 + $0x32] sm:$0xff]  ;;  %v680_v39 = vld [vmem:[%s2476_s0 + $0x5a] sm:$0xff] }
  0x15   :  { %v695_v32 = vpack.c.bf16 %v675_v30, %v674_v29  ;;  %v678_v35 = vld [vmem:[%s2476_s0 + $0x4a] sm:$0xff]  ;;  %v679_v36 = vld [vmem:[%s2476_s0 + $0x52] sm:$0xff]  ;;  %v684_v45 = vld [vmem:[%s2476_s0 + $0x7a] sm:$0xff] }
  0x16   :  { %1715 = vmatmul.mubr.msk.bf16.gmra.mrb[8].mxu1 %vm104_vm0, %v88_v40  ;;  %v697_v38 = vpack.c.bf16 %v679_v36, %v678_v35  ;;  %v681_v40 = vld [vmem:[%s2476_s0 + $0x62] sm:$0xff]  ;;  %v686_v47 = vld [vmem:[%s2476_s0 + $0x8a] sm:$0xff]  ;;  %v691_v54 = vld [vmem:[%s2476_s0 + $0xb2] sm:$0xff] }
  0x17   :  { %1741 = vmatmul.mubr.msk.bf16.gmra.mrb[8].mxu0 %vm104_vm0, %v51_v41  ;;  %1718 = vmatprep.mubr.msk.bf16.mxu1 %vm104_vm0, %v89_v42  ;;  %v682_v41 = vld [vmem:[%s2476_s0 + $0x6a] sm:$0xff]  ;;  %v683_v42 = vld [vmem:[%s2476_s0 + $0x72] sm:$0xff]  ;;  %v685_v46 = vld [vmem:[%s2476_s0 + $0x82] sm:$0xff] }
  0x18   :  { %1758 = vmatprep.mubr.msk.bf16.mxu0 %vm104_vm0, %v462_v43  ;;  %v698_v43 = vpack.c.bf16 %v681_v40, %v680_v39  ;;  %v699_v44 = vpack.c.bf16 %v683_v42, %v682_v41  ;;  %v689_v52 = vld [vmem:[%s2476_s0 + $0xa2] sm:$0xff]  ;;  %v690_v53 = vld [vmem:[%s2476_s0 + $0xaa] sm:$0xff]  ;;  %v2265_v36 = vld [vmem:[%s2478_s2] ss:$0 sm:$0xff] }
  0x19   :  { %v1903_v60 = vld [vmem:[%s2477_s3 + $0x8] sm:$0xff]  }
  0x1e   :  { %1719 = vmatmul.mubr.msk.bf16.gmra.mrb[12].mxu1 %vm104_vm0, %v90_v48  ;;  %v687_v48 = vld [vmem:[%s2476_s0 + $0x92] sm:$0xff] }
  0x1f   :  { %1759 = vmatmul.mubr.msk.bf16.vlgmr.msra.gmra.mrb[0].mxu0 %vm104_vm0, %v463_v49  ;;  %1722 = vmatprep.mubr.msk.bf16.mxu1 %vm104_vm0, %v91_v50  ;;  %v700_v49 = vpack.c.bf16 %v685_v46, %v684_v45  ;;  %v701_v50 = vpack.c.bf16 %v687_v48, %v686_v47 }
  0x20   :  { %1783 = vmatpush3.bf16.msra.mxu0 %v1901_v33  ;;  %1762 = vmatprep.mubr.msk.bf16.mxu0 %vm104_vm0, %v464_v51  ;;  %v676_v33 = vld [vmem:[%s2476_s0 + $0x3a] sm:$0xff] }
  0x21   :  { %v696_v37 = vpack.c.bf16 %v677_v34, %v676_v33  ;;  %v688_v51 = vld [vmem:[%s2476_s0 + $0x9a] sm:$0xff] }
  0x22   :  { %v702_v55 = vpack.c.bf16 %v689_v52, %v688_v51 }
  0x26   :  { %1723 = vmatmul.mubr.msk.bf16.gmra.mrb[16].mxu1 %vm104_vm0, %v92_v56  ;;  %v703_v56 = vpack.c.bf16 %v691_v54, %v690_v53 }
  0x27   :  { %1763 = vmatmul.mubr.msk.bf16.gmra.mrb[4].mxu0 %vm104_vm0, %v465_v57  ;;  %1726 = vmatprep.mubr.msk.bf16.mxu1 %vm104_vm0, %v93_v58  ;;  %v692_v57 = vld [vmem:[%s2476_s0 + $0xba] sm:$0xf] }
  0x28   :  { %1766 = vmatprep.mubr.msk.bf16.mxu0 %vm104_vm0, %v466_v59  ;;  %v704_v58 = vpack.c.bf16 %v692_v57, %v692_v57  ;;  %v1902_v59 = vld [vmem:[%s2477_s3] sm:$0xff]  }
  0x29   :  { %1808 = vmatprep.subr.bf16.mxu1 %v1902_v59 }
  0x2e   :  { %1727 = vmatmul.mubr.msk.bf16.gmra.mrb[20].mxu1 %vm104_vm0, %v94_v63 }
  0x2f   :  { %1767 = vmatmul.mubr.msk.bf16.gmra.mrb[8].mxu0 %vm104_vm0, %v467_v0  ;;  %1744 = vmatprep.mubr.msk.bf16.mxu1 %vm104_vm0, %v52_v1 }
  0x30   :  { %1770 = vmatprep.mubr.msk.bf16.mxu0 %vm104_vm0, %v468_v2 }
  0x36   :  { %1745 = vmatmul.mubr.msk.bf16.vlgmr.msra.gmra.mrb[12].mxu1 %vm104_vm0, %v53_v7 }
  0x37   :  { %1771 = vmatmul.mubr.msk.bf16.gmra.mrb[12].mxu0 %vm104_vm0, %v469_v8  ;;  %1748 = vmatprep.mubr.msk.bf16.mxu1 %vm104_vm0, %v54_v9 }
  0x38   :  { %1774 = vmatprep.mubr.msk.bf16.mxu0 %vm104_vm0, %v470_v10  ;;  %1809 = vmatpush3.bf16.msra.mxu1 %v1902_v59 }
  0x39   :  { %1810 = vmatprep.subr.bf16.mxu1 %v1903_v60 }
  0x3c   :  { %1811 = vmatpush3.bf16.msra.mxu1 %v1903_v60 }
  0x3e   :  { %1749 = vmatmul.mubr.msk.bf16.gmra.mrb[16].mxu1 %vm104_vm0, %v55_v16 }
  0x3f   :  { %1775 = vmatmul.mubr.msk.bf16.gmra.mrb[16].mxu0 %vm104_vm0, %v471_v17  ;;  %1752 = vmatprep.mubr.msk.bf16.mxu1 %vm104_vm0, %v56_v18 }
  0x40   :  { %1778 = vmatprep.mubr.msk.bf16.mxu0 %vm104_vm0, %v472_v19 }
  0x46   :  { %1753 = vmatmul.mubr.msk.bf16.gmra.mrb[24].mxu1 %vm104_vm0, %v57_v24 }
  0x47   :  { %1779 = vmatmul.mubr.msk.bf16.gmra.mrb[20].mxu0 %vm104_vm0, %v473_v25 }
  0x48   :  { %1784 = vmatprep.mubr.msk.bf16.mxu0 %vm104_vm0, %v693_v26 }
  0x4f   :  { %1785 = vmatmul.mubr.msk.bf16.vlgmr.msra.gmra.mrb[0].mxu0 %vm104_vm0, %v694_v31 }
  0x50   :  { %1788 = vmatprep.mubr.msk.bf16.mxu0 %vm104_vm0, %v695_v32 }
  0x57   :  { %1789 = vmatmul.mubr.msk.bf16.gmra.mrb[4].mxu0 %vm104_vm0, %v696_v37 }
  0x58   :  { %1792 = vmatprep.mubr.msk.bf16.mxu0 %vm104_vm0, %v697_v38 }
  0x5f   :  { %1793 = vmatmul.mubr.msk.bf16.gmra.mrb[8].mxu0 %vm104_vm0, %v698_v43 }
  0x60   :  { %1796 = vmatprep.mubr.msk.bf16.mxu0 %vm104_vm0, %v699_v44 }
  0x67   :  { %1797 = vmatmul.mubr.msk.bf16.gmra.mrb[12].mxu0 %vm104_vm0, %v700_v49 }
  0x68   :  { %1800 = vmatprep.mubr.msk.bf16.mxu0 %vm104_vm0, %v701_v50 }
  0x6f   :  { %1801 = vmatmul.mubr.msk.bf16.gmra.mrb[16].mxu0 %vm104_vm0, %v702_v55 }
  0x70   :  { %1804 = vmatprep.mubr.msk.bf16.mxu0 %vm104_vm0, %v703_v56 }
  0x77   :  { %1805 = vmatmul.mubr.msk.bf16.gmra.mrb[24].mxu0 %vm104_vm0, %v704_v58 }
  0xd9   :  { %v1708_v61 = vpop.f32.mrb[0].mxu1 }
  0xda   :  { %v175_v62 = vpop.f32.mrb[1].mxu1 }
  0xdb   :  { %v1709_v63 = vpop.f32.mrb[2].mxu1 }
  0xdc   :  { %v178_v0 = vpop.f32.mrb[3].mxu1 }
  0xe1   :  { %v1712_v1 = vpop.f32.mrb[4].mxu1 }
  0xe2   :  { %v2226_v2 = vpop.f32.mrb[5].mxu1 }
  0xe3   :  { %v2228_v3 = vpop.f32.mrb[6].mxu1 }
  0xe4   :  { %v2230_v4 = vpop.f32.mrb[7].mxu1 }
  0xe9   :  { %v2232_v5 = vpop.f32.mrb[8].mxu1 }
  0xea   :  { %v2234_v6 = vpop.f32.mrb[9].mxu1 }
  0xeb   :  { %v2236_v7 = vpop.f32.mrb[10].mxu1 }
  0xec   :  { %v2238_v8 = vpop.f32.mrb[11].mxu1 }
 0x101   :  { %v1728_v9 = vpop.f32.mrb[20].mxu1 }
 0x102   :  { %v255_v10 = vpop.f32.mrb[21].mxu1 }
 0x103   :  { %v1729_v11 = vpop.f32.mrb[22].mxu1 }
 0x104   :  { %v258_v12 = vpop.f32.mrb[23].mxu1 }
 0x109   :  { %v2240_v13 = vpop.f32.mrb[12].mxu1 }
 0x10a   :  { %v2242_v14 = vpop.f32.mrb[13].mxu1 }
 0x10b   :  { %v2244_v15 = vpop.f32.mrb[14].mxu1 }
 0x10c   :  { %v2246_v16 = vpop.f32.mrb[15].mxu1 }
 0x111   :  { %v2248_v17 = vpop.f32.mrb[16].mxu1 }
 0x112   :  { %v2250_v18 = vpop.f32.mrb[17].mxu1 }
 0x113   :  { %v2252_v19 = vpop.f32.mrb[18].mxu1 }
 0x114   :  { %v2254_v20 = vpop.f32.mrb[19].mxu1 }
 0x119   :  { %v1754_v21 = vpop.f32.mrb[24].mxu1 }
 0x11a   :  { %v434_v22 = vadd.f32 %v1754_v21, %v1728_v9  ;;  %v1780_v23 = vpop.f32.mrb[20].mxu0  ;;  %v425_v24 = vpop.f32.mrb[25].mxu1 }
 0x11b   :  { %v426_v25 = vadd.f32 %v425_v24, %v255_v10  ;;  %v633_v26 = vpop.f32.mrb[21].mxu0  ;;  %v1755_v27 = vpop.f32.mrb[26].mxu1 }
 0x11c   :  { %v2256_v28 = vadd.f32 %v1780_v23, %v434_v22  ;;  %v1781_v29 = vpop.f32.mrb[22].mxu0  ;;  %v428_v30 = vpop.f32.mrb[27].mxu1 }
 0x11d   :  { %v2258_v31 = vadd.f32 %v633_v26, %v426_v25  ;;  %v429_v32 = vadd.f32 %v428_v30, %v258_v12  ;;  %v636_v33 = vpop.f32.mrb[23].mxu0 }
 0x11f   :  { %v2260_v34 = vadd.f32 %v636_v33, %v429_v32 }
 0x122   :  { %v1786_v35 = vpop.f32.mrb[0].mxu0 }
 0x123   :  { %v1838_v37 = vadd.f32 %v1786_v35, %v1708_v61  ;;  %v784_v38 = vpop.f32.mrb[1].mxu0 }
 0x124   :  { %v1839_v39 = vadd.f32 %v784_v38, %v175_v62  ;;  %v1787_v40 = vpop.f32.mrb[2].mxu0 }
 0x125   :  { %v910_v41 = vadd.f32 %v1838_v37, %v2265_v36  ;;  %v1840_v42 = vadd.f32 %v1787_v40, %v1709_v63  ;;  %v787_v43 = vpop.f32.mrb[3].mxu0 }
 0x126   :  { %v908_v44 = vadd.f32 %v1839_v39, %v2265_v36  ;;  %v1841_v45 = vadd.f32 %v787_v43, %v178_v0 }
 0x127   :  { %v933_v46 = vmax.f32 %v910_v41, 0.0  ;;  %v911_v47 = vadd.f32 %v1840_v42, %v2265_v36 }
 0x128   :  { %v931_v48 = vmax.f32 %v908_v44, 0.0  ;;  %v909_v49 = vadd.f32 %v1841_v45, %v2265_v36 }
 0x129   :  { %v1529_v50 = vpack.c.bf16 %v933_v46, %v933_v46  ;;  %v934_v51 = vmax.f32 %v911_v47, 0.0 }
 0x12a   :  { %v1527_v52 = vpack.c.bf16 %v931_v48, %v931_v48  ;;  %v932_v53 = vmax.f32 %v909_v49, 0.0  ;;  %v1790_v54 = vpop.f32.mrb[4].mxu0 }
 0x12b   :  { %1050 = vst.msk [vmem:[%s2479_s5 + $0x8] sm:$0xf] %vm1047_vm1, %v1529_v50  ;;  %v955_v55 = vpack.c.bf16 %v934_v51, %v933_v46  ;;  %v1530_v56 = vpack.c.bf16 %v934_v51, %v934_v51  ;;  %v1842_v57 = vadd.f32 %v1790_v54, %v1712_v1  ;;  %v800_v58 = vpop.f32.mrb[5].mxu0 }
 0x12c   :  { %1048 = vst.msk [vmem:[%s2479_s5] sm:$0xf] %vm1047_vm1, %v1527_v52  ;;  %v954_v59 = vpack.c.bf16 %v932_v53, %v931_v48  ;;  %v1528_v60 = vpack.c.bf16 %v932_v53, %v932_v53  ;;  %v1843_v61 = vadd.f32 %v800_v58, %v2226_v2  ;;  %v1791_v62 = vpop.f32.mrb[6].mxu0 }
 0x12d   :  { %1051 = vst.msk [vmem:[%s2479_s5 + $0xc] sm:$0xf] %vm1047_vm1, %v1530_v56  ;;  %v914_v63 = vadd.f32 %v1842_v57, %v2265_v36  ;;  %v1844_v0 = vadd.f32 %v1791_v62, %v2228_v3  ;;  %v803_v1 = vpop.f32.mrb[7].mxu0 }
 0x12e   :  { %1049 = vst.msk [vmem:[%s2479_s5 + $0x4] sm:$0xf] %vm1047_vm1, %v1528_v60  ;;  %v912_v9 = vadd.f32 %v1843_v61, %v2265_v36  ;;  %v1845_v2 = vadd.f32 %v803_v1, %v2230_v4  ;;  %1812 = vmatprep.mubr.msk.bf16.mxu1 %vm1095_vm2, %v954_v59 }
 0x12f   :  { %v937_v10 = vmax.f32 %v914_v63, 0.0  ;;  %v915_v11 = vadd.f32 %v1844_v0, %v2265_v36  ;;  %1813 = vmatmul.mubr.msk.bf16.vlgmr.msra.gmra.mrb[28].mxu1 %vm1095_vm2, %v955_v55 }
 0x130   :  { %v935_v12 = vmax.f32 %v912_v9, 0.0  ;;  %v913_v3 = vadd.f32 %v1845_v2, %v2265_v36 }
 0x131   :  { %v1533_v21 = vpack.c.bf16 %v937_v10, %v937_v10  ;;  %v938_v22 = vmax.f32 %v915_v11, 0.0 }
 0x132   :  { %v1531_v23 = vpack.c.bf16 %v935_v12, %v935_v12  ;;  %v936_v24 = vmax.f32 %v913_v3, 0.0  ;;  %v1794_v25 = vpop.f32.mrb[8].mxu0 }
 0x133   :  { %1054 = vst.msk [vmem:[%s2479_s5 + $0x18] sm:$0xf] %vm1047_vm1, %v1533_v21  ;;  %v957_v4 = vpack.c.bf16 %v938_v22, %v937_v10  ;;  %v1534_v26 = vpack.c.bf16 %v938_v22, %v938_v22  ;;  %v1846_v27 = vadd.f32 %v1794_v25, %v2232_v5  ;;  %v816_v29 = vpop.f32.mrb[9].mxu0 }
 0x134   :  { %1052 = vst.msk [vmem:[%s2479_s5 + $0x10] sm:$0xf] %vm1047_vm1, %v1531_v23  ;;  %v956_v30 = vpack.c.bf16 %v936_v24, %v935_v12  ;;  %v1532_v32 = vpack.c.bf16 %v936_v24, %v936_v24  ;;  %v1847_v33 = vadd.f32 %v816_v29, %v2234_v6  ;;  %v1795_v35 = vpop.f32.mrb[10].mxu0 }
 0x135   :  { %1055 = vst.msk [vmem:[%s2479_s5 + $0x1c] sm:$0xf] %vm1047_vm1, %v1534_v26  ;;  %v918_v37 = vadd.f32 %v1846_v27, %v2265_v36  ;;  %v1848_v5 = vadd.f32 %v1795_v35, %v2236_v7  ;;  %v819_v38 = vpop.f32.mrb[11].mxu0 }
 0x136   :  { %1053 = vst.msk [vmem:[%s2479_s5 + $0x14] sm:$0xf] %vm1047_vm1, %v1532_v32  ;;  %v916_v39 = vadd.f32 %v1847_v33, %v2265_v36  ;;  %v1849_v6 = vadd.f32 %v819_v38, %v2238_v8  ;;  %1816 = vmatprep.mubr.msk.bf16.mxu1 %vm1095_vm2, %v956_v30 }
 0x137   :  { %v941_v40 = vmax.f32 %v918_v37, 0.0  ;;  %v919_v41 = vadd.f32 %v1848_v5, %v2265_v36  ;;  %1817 = vmatmul.mubr.msk.bf16.gmra.mrb[32].mxu1 %vm1095_vm2, %v957_v4 }
 0x138   :  { %v939_v42 = vmax.f32 %v916_v39, 0.0  ;;  %v917_v7 = vadd.f32 %v1849_v6, %v2265_v36 }
 0x139   :  { %v1537_v43 = vpack.c.bf16 %v941_v40, %v941_v40  ;;  %v942_v44 = vmax.f32 %v919_v41, 0.0 }
 0x13a   :  { %v1535_v45 = vpack.c.bf16 %v939_v42, %v939_v42  ;;  %v940_v46 = vmax.f32 %v917_v7, 0.0  ;;  %v1798_v47 = vpop.f32.mrb[12].mxu0 }
 0x13b   :  { %1058 = vst.msk [vmem:[%s2479_s5 + $0x28] sm:$0xf] %vm1047_vm1, %v1537_v43  ;;  %v959_v8 = vpack.c.bf16 %v942_v44, %v941_v40  ;;  %v1538_v48 = vpack.c.bf16 %v942_v44, %v942_v44  ;;  %v1850_v49 = vadd.f32 %v1798_v47, %v2240_v13  ;;  %v832_v50 = vpop.f32.mrb[13].mxu0 }
 0x13c   :  { %1056 = vst.msk [vmem:[%s2479_s5 + $0x20] sm:$0xf] %vm1047_vm1, %v1535_v45  ;;  %v958_v51 = vpack.c.bf16 %v940_v46, %v939_v42  ;;  %v1536_v52 = vpack.c.bf16 %v940_v46, %v940_v46  ;;  %v1851_v53 = vadd.f32 %v832_v50, %v2242_v14  ;;  %v1799_v54 = vpop.f32.mrb[14].mxu0 }
 0x13d   :  { %1059 = vst.msk [vmem:[%s2479_s5 + $0x2c] sm:$0xf] %vm1047_vm1, %v1538_v48  ;;  %v922_v55 = vadd.f32 %v1850_v49, %v2265_v36  ;;  %v1852_v13 = vadd.f32 %v1799_v54, %v2244_v15  ;;  %v835_v56 = vpop.f32.mrb[15].mxu0 }
 0x13e   :  { %1057 = vst.msk [vmem:[%s2479_s5 + $0x24] sm:$0xf] %vm1047_vm1, %v1536_v52  ;;  %v920_v57 = vadd.f32 %v1851_v53, %v2265_v36  ;;  %v1853_v14 = vadd.f32 %v835_v56, %v2246_v16  ;;  %1820 = vmatprep.mubr.msk.bf16.mxu1 %vm1095_vm2, %v958_v51 }
 0x13f   :  { %v945_v58 = vmax.f32 %v922_v55, 0.0  ;;  %v923_v59 = vadd.f32 %v1852_v13, %v2265_v36  ;;  %1821 = vmatmul.mubr.msk.bf16.gmra.mrb[36].mxu1 %vm1095_vm2, %v959_v8 }
 0x140   :  { %v943_v60 = vmax.f32 %v920_v57, 0.0  ;;  %v921_v15 = vadd.f32 %v1853_v14, %v2265_v36 }
 0x141   :  { %v1541_v61 = vpack.c.bf16 %v945_v58, %v945_v58  ;;  %v946_v62 = vmax.f32 %v923_v59, 0.0 }
 0x142   :  { %v1539_v63 = vpack.c.bf16 %v943_v60, %v943_v60  ;;  %v944_v0 = vmax.f32 %v921_v15, 0.0  ;;  %v1802_v1 = vpop.f32.mrb[16].mxu0 }
 0x143   :  { %1062 = vst.msk [vmem:[%s2479_s5 + $0x38] sm:$0xf] %vm1047_vm1, %v1541_v61  ;;  %v961_v16 = vpack.c.bf16 %v946_v62, %v945_v58  ;;  %v1542_v9 = vpack.c.bf16 %v946_v62, %v946_v62  ;;  %v1854_v2 = vadd.f32 %v1802_v1, %v2248_v17  ;;  %v848_v10 = vpop.f32.mrb[17].mxu0 }
 0x144   :  { %1060 = vst.msk [vmem:[%s2479_s5 + $0x30] sm:$0xf] %vm1047_vm1, %v1539_v63  ;;  %v960_v11 = vpack.c.bf16 %v944_v0, %v943_v60  ;;  %v1540_v12 = vpack.c.bf16 %v944_v0, %v944_v0  ;;  %v1855_v3 = vadd.f32 %v848_v10, %v2250_v18  ;;  %v1803_v21 = vpop.f32.mrb[18].mxu0 }
 0x145   :  { %1063 = vst.msk [vmem:[%s2479_s5 + $0x3c] sm:$0xf] %vm1047_vm1, %v1542_v9  ;;  %v926_v22 = vadd.f32 %v1854_v2, %v2265_v36  ;;  %v1856_v17 = vadd.f32 %v1803_v21, %v2252_v19  ;;  %v851_v23 = vpop.f32.mrb[19].mxu0 }
 0x146   :  { %1061 = vst.msk [vmem:[%s2479_s5 + $0x34] sm:$0xf] %vm1047_vm1, %v1540_v12  ;;  %v924_v24 = vadd.f32 %v1855_v3, %v2265_v36  ;;  %v1857_v18 = vadd.f32 %v851_v23, %v2254_v20  ;;  %1824 = vmatprep.mubr.msk.bf16.mxu1 %vm1095_vm2, %v960_v11 }
 0x147   :  { %v949_v25 = vmax.f32 %v926_v22, 0.0  ;;  %v927_v4 = vadd.f32 %v1856_v17, %v2265_v36  ;;  %1825 = vmatmul.mubr.msk.bf16.gmra.mrb[40].mxu1 %vm1095_vm2, %v961_v16 }
 0x148   :  { %v947_v26 = vmax.f32 %v924_v24, 0.0  ;;  %v925_v19 = vadd.f32 %v1857_v18, %v2265_v36 }
 0x149   :  { %v1545_v27 = vpack.c.bf16 %v949_v25, %v949_v25  ;;  %v950_v29 = vmax.f32 %v927_v4, 0.0 }
 0x14a   :  { %v1543_v30 = vpack.c.bf16 %v947_v26, %v947_v26  ;;  %v948_v32 = vmax.f32 %v925_v19, 0.0  ;;  %v1806_v33 = vpop.f32.mrb[24].mxu0 }
 0x14b   :  { %1066 = vst.msk [vmem:[%s2479_s5 + $0x48] sm:$0xf] %vm1047_vm1, %v1545_v27  ;;  %v963_v20 = vpack.c.bf16 %v950_v29, %v949_v25  ;;  %v1546_v35 = vpack.c.bf16 %v950_v29, %v950_v29  ;;  %v900_v37 = vadd.f32 %v1806_v33, %v2256_v28  ;;  %v864_v5 = vpop.f32.mrb[25].mxu0 }
 0x14c   :  { %1064 = vst.msk [vmem:[%s2479_s5 + $0x40] sm:$0xf] %vm1047_vm1, %v1543_v30  ;;  %v962_v38 = vpack.c.bf16 %v948_v32, %v947_v26  ;;  %v1544_v39 = vpack.c.bf16 %v948_v32, %v948_v32  ;;  %v898_v6 = vadd.f32 %v864_v5, %v2258_v31  ;;  %v1807_v40 = vpop.f32.mrb[26].mxu0 }
 0x14d   :  { %1067 = vst.msk [vmem:[%s2479_s5 + $0x4c] sm:$0xf] %vm1047_vm1, %v1546_v35  ;;  %v930_v41 = vadd.f32 %v2265_v36, %v900_v37  ;;  %v867_v42 = vpop.f32.mrb[27].mxu0 }
 0x14e   :  { %1065 = vst.msk [vmem:[%s2479_s5 + $0x44] sm:$0xf] %vm1047_vm1, %v1544_v39  ;;  %v928_v28 = vadd.f32 %v2265_v36, %v898_v6  ;;  %v899_v7 = vadd.f32 %v867_v42, %v2260_v34  ;;  %1828 = vmatprep.mubr.msk.bf16.mxu1 %vm1095_vm2, %v962_v38 }
 0x14f   :  { %v953_v31 = vmax.f32 %v930_v41, 0.0  ;;  %1829 = vmatmul.mubr.msk.bf16.gmra.mrb[44].mxu1 %vm1095_vm2, %v963_v20 }
 0x150   :  { %v951_v43 = vmax.f32 %v928_v28, 0.0  ;;  %v929_v44 = vadd.f32 %v2265_v36, %v899_v7  ;;  %v2414_v36 = vld [vmem:[%s2480_s4] ss:$0 sm:$0xff] }
 0x151   :  { %v965_v45 = vpack.c.bf16 %v953_v31, %v953_v31 }
 0x152   :  { %v1547_v46 = vpack.c.bf16 %v951_v43, %v951_v43  ;;  %v952_v47 = vmax.f32 %v929_v44, 0.0 }
 0x153   :  { %1071 = vst.msk [vmem:[%s2479_s5 + $0x58] sm:$0x3] %vm1070_vm3, %v965_v45 }
 0x154   :  { %1068 = vst.msk [vmem:[%s2479_s5 + $0x50] sm:$0xf] %vm1047_vm1, %v1547_v46  ;;  %v964_v34 = vpack.c.bf16 %v952_v47, %v951_v43  ;;  %v1548_v8 = vpack.c.bf16 %v952_v47, %v952_v47 }
 0x156   :  { %1069 = vst.msk [vmem:[%s2479_s5 + $0x54] sm:$0xf] %vm1047_vm1, %v1548_v8  ;;  %1832 = vmatprep.mubr.msk.bf16.mxu1 %vm1095_vm2, %v964_v34 }
 0x157   :  { %1833 = vmatmul.mubr.msk.bf16.gmra.mrb[48].mxu1 %vm1095_vm2, %v965_v45 }
 0x202   :  { %v1814_v48 = vpop.f32.mrb[28].mxu1 }
 0x203   :  { %v1175_v49 = vadd.f32 %v1814_v48, %v2414_v36  ;;  %v1166_v50 = vpop.f32.mrb[29].mxu1 }
 0x204   :  { %v1167_v51 = vadd.f32 %v2414_v36, %v1166_v50  ;;  %v1815_v52 = vpop.f32.mrb[30].mxu1 }
 0x205   :  { %v1178_v53 = vadd.f32 %v1815_v52, %v2414_v36  ;;  %v1169_v54 = vpop.f32.mrb[31].mxu1  ;;  %v1262_v13 = vmax.f32 %v1175_v49, 0.0 }
 0x206   :  { %v1170_v55 = vadd.f32 %v2414_v36, %v1169_v54  ;;  %v1260_v57 = vmax.f32 %v1167_v51, 0.0 }
 0x207   :  { %v1263_v56 = vmax.f32 %v1178_v53, 0.0 }
 0x208   :  { %v1261_v14 = vmax.f32 %v1170_v55, 0.0 }
 0x209   :  { %v1581_v58 = vpack.c.bf16 %v1263_v56, %v1262_v13 }
 0x20a   :  { %v1576_v59 = vpack.c.bf16 %v1261_v14, %v1260_v57  ;;  %v1818_v60 = vpop.f32.mrb[32].mxu1 }
 0x20b   :  { %1628 = vst [vmem:[%s2481_s6 + $0x8] sm:$0xff] %v1581_v58   ;;  %v1191_v15 = vadd.f32 %v1818_v60, %v2414_v36  ;;  %v1182_v61 = vpop.f32.mrb[33].mxu1 }
 0x20c   :  { %1577 = vst [vmem:[%s2481_s6] sm:$0xff] %v1576_v59   ;;  %v1183_v62 = vadd.f32 %v2414_v36, %v1182_v61  ;;  %v1819_v63 = vpop.f32.mrb[34].mxu1 }
 0x20d   :  { %v1194_v0 = vadd.f32 %v1819_v63, %v2414_v36  ;;  %v1185_v1 = vpop.f32.mrb[35].mxu1  ;;  %v1266_v9 = vmax.f32 %v1191_v15, 0.0 }
 0x20e   :  { %v1186_v16 = vadd.f32 %v2414_v36, %v1185_v1  ;;  %v1264_v10 = vmax.f32 %v1183_v62, 0.0 }
 0x20f   :  { %v1267_v2 = vmax.f32 %v1194_v0, 0.0 }
 0x210   :  { %v1265_v11 = vmax.f32 %v1186_v16, 0.0 }
 0x211   :  { %v1591_v12 = vpack.c.bf16 %v1267_v2, %v1266_v9 }
 0x212   :  { %v1586_v3 = vpack.c.bf16 %v1265_v11, %v1264_v10  ;;  %v1822_v21 = vpop.f32.mrb[36].mxu1 }
 0x213   :  { %1630 = vst [vmem:[%s2481_s6 + $0x18] sm:$0xff] %v1591_v12   ;;  %v1207_v22 = vadd.f32 %v1822_v21, %v2414_v36  ;;  %v1198_v17 = vpop.f32.mrb[37].mxu1 }
 0x214   :  { %1629 = vst [vmem:[%s2481_s6 + $0x10] sm:$0xff] %v1586_v3   ;;  %v1199_v23 = vadd.f32 %v2414_v36, %v1198_v17  ;;  %v1823_v24 = vpop.f32.mrb[38].mxu1 }
 0x215   :  { %v1210_v18 = vadd.f32 %v1823_v24, %v2414_v36  ;;  %v1201_v25 = vpop.f32.mrb[39].mxu1  ;;  %v1270_v26 = vmax.f32 %v1207_v22, 0.0 }
 0x216   :  { %v1202_v4 = vadd.f32 %v2414_v36, %v1201_v25  ;;  %v1268_v27 = vmax.f32 %v1199_v23, 0.0 }
 0x217   :  { %v1271_v19 = vmax.f32 %v1210_v18, 0.0 }
 0x218   :  { %v1269_v29 = vmax.f32 %v1202_v4, 0.0 }
 0x219   :  { %v1601_v30 = vpack.c.bf16 %v1271_v19, %v1270_v26 }
 0x21a   :  { %v1596_v32 = vpack.c.bf16 %v1269_v29, %v1268_v27  ;;  %v1826_v33 = vpop.f32.mrb[40].mxu1 }
 0x21b   :  { %1632 = vst [vmem:[%s2481_s6 + $0x28] sm:$0xff] %v1601_v30   ;;  %v1223_v20 = vadd.f32 %v1826_v33, %v2414_v36  ;;  %v1214_v35 = vpop.f32.mrb[41].mxu1 }
 0x21c   :  { %1631 = vst [vmem:[%s2481_s6 + $0x20] sm:$0xff] %v1596_v32   ;;  %v1215_v37 = vadd.f32 %v2414_v36, %v1214_v35  ;;  %v1827_v5 = vpop.f32.mrb[42].mxu1 }
 0x21d   :  { %v1226_v38 = vadd.f32 %v1827_v5, %v2414_v36  ;;  %v1217_v39 = vpop.f32.mrb[43].mxu1  ;;  %v1274_v40 = vmax.f32 %v1223_v20, 0.0 }
 0x21e   :  { %v1218_v6 = vadd.f32 %v2414_v36, %v1217_v39  ;;  %v1272_v42 = vmax.f32 %v1215_v37, 0.0 }
 0x21f   :  { %v1275_v41 = vmax.f32 %v1226_v38, 0.0 }
 0x220   :  { %v1273_v28 = vmax.f32 %v1218_v6, 0.0 }
 0x221   :  { %v1611_v7 = vpack.c.bf16 %v1275_v41, %v1274_v40 }
 0x222   :  { %v1606_v31 = vpack.c.bf16 %v1273_v28, %v1272_v42  ;;  %v1830_v43 = vpop.f32.mrb[44].mxu1 }
 0x223   :  { %1634 = vst [vmem:[%s2481_s6 + $0x38] sm:$0xff] %v1611_v7   ;;  %v1239_v44 = vadd.f32 %v1830_v43, %v2414_v36  ;;  %v1230_v45 = vpop.f32.mrb[45].mxu1 }
 0x224   :  { %1633 = vst [vmem:[%s2481_s6 + $0x30] sm:$0xff] %v1606_v31   ;;  %v1231_v46 = vadd.f32 %v2414_v36, %v1230_v45  ;;  %v1831_v47 = vpop.f32.mrb[46].mxu1 }
 0x225   :  { %v1242_v34 = vadd.f32 %v1831_v47, %v2414_v36  ;;  %v1233_v8 = vpop.f32.mrb[47].mxu1  ;;  %v1278_v49 = vmax.f32 %v1239_v44, 0.0 }
 0x226   :  { %v1234_v48 = vadd.f32 %v2414_v36, %v1233_v8  ;;  %v1276_v51 = vmax.f32 %v1231_v46, 0.0 }
 0x227   :  { %v1279_v50 = vmax.f32 %v1242_v34, 0.0 }
 0x228   :  { %v1277_v52 = vmax.f32 %v1234_v48, 0.0 }
 0x229   :  { %v1621_v53 = vpack.c.bf16 %v1279_v50, %v1278_v49 }
 0x22a   :  { %v1616_v54 = vpack.c.bf16 %v1277_v52, %v1276_v51  ;;  %v1834_v55 = vpop.f32.mrb[48].mxu1 }
 0x22b   :  { %1636 = vst [vmem:[%s2481_s6 + $0x48] sm:$0xff] %v1621_v53   ;;  %v1255_v13 = vadd.f32 %v1834_v55, %v2414_v36  ;;  %v1246_v56 = vpop.f32.mrb[49].mxu1 }
 0x22c   :  { %1635 = vst [vmem:[%s2481_s6 + $0x40] sm:$0xff] %v1616_v54   ;;  %v1247_v57 = vadd.f32 %v2414_v36, %v1246_v56  ;;  %v1835_v14 = vpop.f32.mrb[50].mxu1 }
 0x22d   :  { %v1282_v58 = vmax.f32 %v1255_v13, 0.0  ;;  %v1249_v59 = vpop.f32.mrb[51].mxu1 }
 0x22e   :  { %v1250_v60 = vadd.f32 %v2414_v36, %v1249_v59  ;;  %v1280_v61 = vmax.f32 %v1247_v57, 0.0 }
 0x22f   :  { %v1572_v15 = vpack.c.bf16 %v1282_v58, %v1282_v58 }
 0x230   :  { %v1281_v62 = vmax.f32 %v1250_v60, 0.0 }
 0x231   :  { %1398 = vst [vmem:[%s2481_s6 + $0x58] sm:$0x3] %v1572_v15 }
 0x232   :  { %v1626_v63 = vpack.c.bf16 %v1281_v62, %v1280_v61 }
 0x234   :  { %1637 = vst [vmem:[%s2481_s6 + $0x50] sm:$0xff] %v1626_v63  }

// kernel: sparse_bev_oe_forward.4
= control target key start
LH: loop header
LB: loop body
LE: loop exit
PB: predicated region body
PF: predicated region fallthrough
CT: control target
= control target key end

     0   :  { %s1545_s0 = inlined_call_operand.vmem [shape: f32[72,128], index: 0, kind: input, shape index: {}]   ;;  %s1546_s1 = inlined_call_operand.vmem [shape: bf16[4,128,64], index: 1, kind: input, shape index: {}]   ;;  %s1547_s2 = inlined_call_operand.vmem [shape: f32[1,64], index: 2, kind: input, shape index: {}]   ;;  %s1548_s3 = inlined_call_operand.vmem [shape: bf16[64,128], index: 3, kind: input, shape index: {}]   ;;  %s1549_s4 = inlined_call_operand.vmem [shape: f32[1,128], index: 4, kind: input, shape index: {}]   ;;  %s1550_s5 = inlined_call_operand.hbm [shape: bf16[60,64], index: 5, kind: output, shape index: {0}]   ;;  %s1551_s6 = inlined_call_operand.vmem [shape: bf16[60,128], index: 6, kind: output, shape index: {1}]  }
   0x1   :  { %v1199_v0 = vld [vmem:[%s1546_s1 + $0x40] sm:$0xff]   ;;  %v1201_v2 = vld [vmem:[%s1546_s1 + $0x48] sm:$0xff]   ;;  %v1203_v4 = vld [vmem:[%s1546_s1 + $0x50] sm:$0xff]  }
   0x2   :  { %v1200_v1 = vld [vmem:[%s1546_s1 + $0x80] sm:$0xff]   ;;  %1052 = vmatprep.subr.bf16.mxu1 %v1199_v0  ;;  %v1202_v3 = vld [vmem:[%s1546_s1 + $0x88] sm:$0xff]   ;;  %v1204_v5 = vld [vmem:[%s1546_s1 + $0x90] sm:$0xff]  }
   0x3   :  { %1100 = vmatprep.subr.bf16.mxu0 %v1200_v1  ;;  %1053 = vmatpush3.bf16.msra.mxu1 %v1199_v0  ;;  %v1205_v6 = vld [vmem:[%s1546_s1 + $0x58] sm:$0xff]   ;;  %v1207_v8 = vld [vmem:[%s1546_s1 + $0x60] sm:$0xff]   ;;  %v1209_v10 = vld [vmem:[%s1546_s1 + $0x68] sm:$0xff]  }
   0x4   :  { %1101 = vmatpush3.bf16.msra.mxu0 %v1200_v1  ;;  %1054 = vmatprep.subr.bf16.mxu1 %v1201_v2  ;;  %v1206_v7 = vld [vmem:[%s1546_s1 + $0x98] sm:$0xff]   ;;  %v1208_v9 = vld [vmem:[%s1546_s1 + $0xa0] sm:$0xff]   ;;  %v53_v12 = vld [vmem:[%s1545_s0 + $0x9] sm:$0xff] }
   0x5   :  { %1102 = vmatprep.subr.bf16.mxu0 %v1202_v3  ;;  %v52_v11 = vld [vmem:[%s1545_s0 + $0x1] sm:$0xff]  ;;  %v308_v16 = vld [vmem:[%s1545_s0 + $0xd] sm:$0xff]  ;;  %v1213_v20 = vld [vmem:[%s1546_s1 + $0x78] sm:$0xff]  }
   0x6   :  { %v1210_v13 = vld [vmem:[%s1546_s1 + $0xa8] sm:$0xff]   ;;  %v60_v14 = vpack.c.bf16 %v53_v12, %v52_v11  ;;  %v1211_v18 = vld [vmem:[%s1546_s1 + $0x70] sm:$0xff]   ;;  %v1214_v21 = vld [vmem:[%s1546_s1 + $0xb8] sm:$0xff]  }
   0x7   :  { %1055 = vmatpush3.bf16.msra.mxu1 %v1201_v2  ;;  %v307_v15 = vld [vmem:[%s1545_s0 + $0x5] sm:$0xff]  ;;  %v1212_v19 = vld [vmem:[%s1546_s1 + $0xb0] sm:$0xff]   ;;  %v55_v24 = vld [vmem:[%s1545_s0 + $0x19] sm:$0xff] }
   0x8   :  { %1103 = vmatpush3.bf16.msra.mxu0 %v1202_v3  ;;  %1056 = vmatprep.subr.bf16.mxu1 %v1203_v4  ;;  %v315_v17 = vpack.c.bf16 %v308_v16, %v307_v15  ;;  %v54_v22 = vld [vmem:[%s1545_s0 + $0x11] sm:$0xff]  ;;  %v1215_v23 = vld [vmem:[%s1546_s1] sm:$0xff]   ;;  %v57_v31 = vld [vmem:[%s1545_s0 + $0x29] sm:$0xff] }
   0x9   :  { %1104 = vmatprep.subr.bf16.mxu0 %v1204_v5  ;;  %1068 = vmatprep.mubr.bf16.mxu1 %v60_v14  ;;  %v309_v25 = vld [vmem:[%s1545_s0 + $0x15] sm:$0xff]  ;;  %v310_v26 = vld [vmem:[%s1545_s0 + $0x1d] sm:$0xff]  ;;  %v61_v28 = vpack.c.bf16 %v55_v24, %v54_v22  ;;  %v311_v32 = vld [vmem:[%s1545_s0 + $0x25] sm:$0xff] }
   0xa   :  { %1116 = vmatprep.mubr.bf16.mxu0 %v315_v17  ;;  %v1216_v27 = vld [vmem:[%s1546_s1 + $0xc0] sm:$0xff]   ;;  %v316_v30 = vpack.c.bf16 %v310_v26, %v309_v25  ;;  %v312_v33 = vld [vmem:[%s1545_s0 + $0x2d] sm:$0xff]  ;;  %v59_v40 = vld [vmem:[%s1545_s0 + $0x39] sm:$0xf] }
   0xb   :  { %1057 = vmatpush3.bf16.msra.mxu1 %v1203_v4  ;;  %v56_v29 = vld [vmem:[%s1545_s0 + $0x21] sm:$0xff]  ;;  %v58_v37 = vld [vmem:[%s1545_s0 + $0x31] sm:$0xff]  ;;  %v317_v39 = vpack.c.bf16 %v312_v33, %v311_v32  ;;  %v314_v42 = vld [vmem:[%s1545_s0 + $0x3d] sm:$0xf] }
   0xc   :  { %1105 = vmatpush3.bf16.msra.mxu0 %v1204_v5  ;;  %1058 = vmatprep.subr.bf16.mxu1 %v1205_v6  ;;  %v1217_v34 = vld [vmem:[%s1546_s1 + $0x8] sm:$0xff]   ;;  %v62_v36 = vpack.c.bf16 %v57_v31, %v56_v29  ;;  %v1219_v38 = vld [vmem:[%s1546_s1 + $0x10] sm:$0xff]   ;;  %v63_v44 = vpack.c.bf16 %v59_v40, %v58_v37  ;;  %v24_v45 = vld [vmem:[%s1545_s0] sm:$0xff] }
   0xd   :  { %1106 = vmatprep.subr.bf16.mxu0 %v1206_v7  ;;  %v1218_v35 = vld [vmem:[%s1546_s1 + $0xc8] sm:$0xff]   ;;  %v313_v41 = vld [vmem:[%s1545_s0 + $0x35] sm:$0xff]  ;;  %v1223_v53 = vld [vmem:[%s1546_s1 + $0x20] sm:$0xff]  }
   0xe   :  { %v1220_v43 = vld [vmem:[%s1546_s1 + $0xd0] sm:$0xff]   ;;  %v25_v46 = vld [vmem:[%s1545_s0 + $0x8] sm:$0xff]  ;;  %v318_v47 = vpack.c.bf16 %v314_v42, %v313_v41  ;;  %v1221_v50 = vld [vmem:[%s1546_s1 + $0x18] sm:$0xff]  }
   0xf   :  { %1059 = vmatpush3.bf16.msra.mxu1 %v1205_v6  ;;  %v457_v48 = vld [vmem:[%s1545_s0 + $0x6] sm:$0xff]  ;;  %v458_v49 = vld [vmem:[%s1545_s0 + $0xe] sm:$0xff]  ;;  %v1222_v51 = vld [vmem:[%s1546_s1 + $0xd8] sm:$0xff]   ;;  %v32_v52 = vpack.c.bf16 %v25_v46, %v24_v45 }
  0x10   :  { %1107 = vmatpush3.bf16.msra.mxu0 %v1206_v7  ;;  %1060 = vmatprep.subr.bf16.mxu1 %v1207_v8  ;;  %v465_v54 = vpack.c.bf16 %v458_v49, %v457_v48  ;;  %v1224_v55 = vld [vmem:[%s1546_s1 + $0xe0] sm:$0xff]  }
  0x11   :  { %1108 = vmatprep.subr.bf16.mxu0 %v1208_v9 }
  0x13   :  { %1061 = vmatpush3.bf16.msra.mxu1 %v1207_v8 }
  0x14   :  { %1109 = vmatpush3.bf16.msra.mxu0 %v1208_v9  ;;  %1062 = vmatprep.subr.bf16.mxu1 %v1209_v10 }
  0x15   :  { %1110 = vmatprep.subr.bf16.mxu0 %v1210_v13 }
  0x17   :  { %1063 = vmatpush3.bf16.msra.mxu1 %v1209_v10 }
  0x18   :  { %1111 = vmatpush3.bf16.msra.mxu0 %v1210_v13  ;;  %1064 = vmatprep.subr.bf16.mxu1 %v1211_v18 }
  0x19   :  { %1112 = vmatprep.subr.bf16.mxu0 %v1212_v19 }
  0x1b   :  { %1065 = vmatpush3.bf16.msra.mxu1 %v1211_v18 }
  0x1c   :  { %1113 = vmatpush3.bf16.msra.mxu0 %v1212_v19  ;;  %1066 = vmatprep.subr.bf16.mxu1 %v1213_v20 }
  0x1d   :  { %1114 = vmatprep.subr.bf16.mxu0 %v1214_v21 }
  0x1f   :  { %1067 = vmatpush3.bf16.msra.mxu1 %v1213_v20 }
  0x20   :  { %1115 = vmatpush3.bf16.msra.mxu0 %v1214_v21  ;;  %1076 = vmatprep.subr.bf16.mxu1 %v1215_v23 }
  0x21   :  { %1124 = vmatprep.subr.bf16.mxu0 %v1216_v27 }
  0x22   :  { %1069 = vmatmul.mubr.bf16.vlgmr.msra.gmra.mrb[0].mxu1 %v61_v28 }
  0x23   :  { %1077 = vmatpush3.bf16.msra.mxu1 %v1215_v23  ;;  %1117 = vmatmul.mubr.bf16.vlgmr.msra.gmra.mrb[0].mxu0 %v316_v30 }
  0x24   :  { %1125 = vmatpush3.bf16.msra.mxu0 %v1216_v27  ;;  %1078 = vmatprep.subr.bf16.mxu1 %v1217_v34 }
  0x25   :  { %1126 = vmatprep.subr.bf16.mxu0 %v1218_v35  ;;  %1072 = vmatprep.mubr.bf16.mxu1 %v62_v36 }
  0x26   :  { %1120 = vmatprep.mubr.bf16.mxu0 %v317_v39 }
  0x27   :  { %1079 = vmatpush3.bf16.msra.mxu1 %v1217_v34 }
  0x28   :  { %1127 = vmatpush3.bf16.msra.mxu0 %v1218_v35  ;;  %1080 = vmatprep.subr.bf16.mxu1 %v1219_v38 }
  0x29   :  { %1128 = vmatprep.subr.bf16.mxu0 %v1220_v43 }
  0x2a   :  { %1073 = vmatmul.mubr.bf16.gmra.mrb[4].mxu1 %v63_v44 }
  0x2b   :  { %1081 = vmatpush3.bf16.msra.mxu1 %v1219_v38  ;;  %1121 = vmatmul.mubr.bf16.gmra.mrb[4].mxu0 %v318_v47 }
  0x2c   :  { %1129 = vmatpush3.bf16.msra.mxu0 %v1220_v43  ;;  %1082 = vmatprep.subr.bf16.mxu1 %v1221_v50 }
  0x2d   :  { %1130 = vmatprep.subr.bf16.mxu0 %v1222_v51  ;;  %1092 = vmatprep.mubr.bf16.mxu1 %v32_v52 }
  0x2e   :  { %12 = vsyncpa [#allocation3], 0  ;;  %1140 = vmatprep.mubr.bf16.mxu0 %v465_v54  ;;  %v1225_v56 = vld [vmem:[%s1546_s1 + $0x28] sm:$0xff]   ;;  %v1227_v58 = vld [vmem:[%s1546_s1 + $0x30] sm:$0xff]   ;;  %vm662_vm0 = vcmask 519168   ;;  %vm711_vm1 = vcmask 523264  }
  0x2f   :  { %1083 = vmatpush3.bf16.msra.mxu1 %v1221_v50  ;;  %v1226_v57 = vld [vmem:[%s1546_s1 + $0xe8] sm:$0xff]   ;;  %v1228_v59 = vld [vmem:[%s1546_s1 + $0xf0] sm:$0xff]   ;;  %v1229_v60 = vld [vmem:[%s1546_s1 + $0x38] sm:$0xff]   ;;  %vm670_vm2 = vcmask 517120  }
  0x30   :  { %1131 = vmatpush3.bf16.msra.mxu0 %v1222_v51  ;;  %1084 = vmatprep.subr.bf16.mxu1 %v1223_v53  ;;  %v1230_v61 = vld [vmem:[%s1546_s1 + $0xf8] sm:$0xff]   ;;  %v26_v62 = vld [vmem:[%s1545_s0 + $0x10] sm:$0xff]  ;;  %v28_v2 = vld [vmem:[%s1545_s0 + $0x20] sm:$0xff] }
  0x31   :  { %1132 = vmatprep.subr.bf16.mxu0 %v1224_v55  ;;  %v27_v63 = vld [vmem:[%s1545_s0 + $0x18] sm:$0xff]  ;;  %v29_v3 = vld [vmem:[%s1545_s0 + $0x28] sm:$0xff]  ;;  %v1231_v6 = vld [vmem:[%s1548_s3] sm:$0xff]  }
  0x32   :  { %v459_v0 = vld [vmem:[%s1545_s0 + $0x16] sm:$0xff]  ;;  %v460_v1 = vld [vmem:[%s1545_s0 + $0x1e] sm:$0xff]  ;;  %v461_v4 = vld [vmem:[%s1545_s0 + $0x26] sm:$0xff]  ;;  %v33_v7 = vpack.c.bf16 %v27_v63, %v26_v62  ;;  %v34_v9 = vpack.c.bf16 %v29_v3, %v28_v2 }
  0x33   :  { %1085 = vmatpush3.bf16.msra.mxu1 %v1223_v53  ;;  %v462_v5 = vld [vmem:[%s1545_s0 + $0x2e] sm:$0xff]  ;;  %v466_v8 = vpack.c.bf16 %v460_v1, %v459_v0  ;;  %v31_v12 = vld [vmem:[%s1545_s0 + $0x38] sm:$0xf]  ;;  %v464_v14 = vld [vmem:[%s1545_s0 + $0x3e] sm:$0xf] }
  0x34   :  { %1133 = vmatpush3.bf16.msra.mxu0 %v1224_v55  ;;  %1086 = vmatprep.subr.bf16.mxu1 %v1225_v56  ;;  %v467_v10 = vpack.c.bf16 %v462_v5, %v461_v4  ;;  %v30_v11 = vld [vmem:[%s1545_s0 + $0x30] sm:$0xff]  ;;  %v1232_v17 = vld [vmem:[%s1548_s3 + $0x8] sm:$0xff]   ;;  %v1234_v19 = vld [vmem:[%s1548_s3 + $0x18] sm:$0xff]  }
  0x35   :  { %1134 = vmatprep.subr.bf16.mxu0 %v1226_v57  ;;  %v463_v13 = vld [vmem:[%s1545_s0 + $0x36] sm:$0xff]  ;;  %v35_v15 = vpack.c.bf16 %v31_v12, %v30_v11  ;;  %v937_v22 = vld [vmem:[%s1547_s2] ss:$0 sm:$0xff]  ;;  %s1259_s2 = smov [#allocation2]  }
  0x36   :  { %v468_v16 = vpack.c.bf16 %v464_v14, %v463_v13  ;;  %v1233_v18 = vld [vmem:[%s1548_s3 + $0x10] sm:$0xff]   ;;  %s842_s3 = sshll.u32 %s1259_s2, 4  ;;  %s843_s3 = int_to_ptr.vmem [resolvable:$true] %s842_s3 }
  0x37   :  { %1087 = vmatpush3.bf16.msra.mxu1 %v1225_v56  ;;  %s1235_s1 = scalar_lea.vmem %s843_s3, 512  ;;  %p1240_p1 = scmp.lt.s32.totalorder %s843_s3, %s843_s3 }
  0x38   :  { %1135 = vmatpush3.bf16.msra.mxu0 %v1226_v57  ;;  %1088 = vmatprep.subr.bf16.mxu1 %v1227_v58  ;;  %p1236_p0 = scmp.ne.s32.totalorder %s843_s3, %s1235_s1  ;;  %p1241_p2 = scmp.lt.s32.totalorder %s1235_s1, %s1235_s1 }
  0x39   :  { %1136 = vmatprep.subr.bf16.mxu0 %v1228_v59 }
  0x3a   :  { %p1242_p3 = por %p1241_p2, %p1240_p1 }
  0x3b   :  { %1089 = vmatpush3.bf16.msra.mxu1 %v1227_v58 }
  0x3c   :  { %1137 = vmatpush3.bf16.msra.mxu0 %v1228_v59  ;;  %1090 = vmatprep.subr.bf16.mxu1 %v1229_v60  ;;  %p1243_p4 = pnand %p1242_p3, %p1236_p0 }
  0x3d   :  { %1138 = vmatprep.subr.bf16.mxu0 %v1230_v61 }
  0x3f   :  { %1091 = vmatpush3.bf16.msra.mxu1 %v1229_v60 }
  0x40   :  { %1139 = vmatpush3.bf16.msra.mxu0 %v1230_v61  ;;  %1164 = vmatprep.subr.bf16.mxu1 %v1231_v6 }
  0x41   :  { %1148 = vmatprep.subr.bf16.mxu0 %v1231_v6 }
  0x42   :  { %1093 = vmatmul.mubr.bf16.vlgmr.msra.gmra.mrb[0].mxu1 %v33_v7 }
  0x43   :  { %1141 = vmatmul.mubr.bf16.vlgmr.msra.gmra.mrb[0].mxu0 %v466_v8  ;;  %1096 = vmatprep.mubr.bf16.mxu1 %v34_v9 }
  0x44   :  { %1144 = vmatprep.mubr.bf16.mxu0 %v467_v10  ;;  %1149 = vmatpush3.bf16.msra.mxu0 %v1231_v6 }
  0x45   :  { %1168 = vmatpush3.bf16.msra.mxu1 %v1231_v6  ;;  %1150 = vmatprep.subr.bf16.mxu0 %v1232_v17 }
  0x46   :  { %1165 = vmatprep.subr.bf16.mxu1 %v1232_v17 }
  0x48   :  { %1151 = vmatpush3.bf16.msra.mxu0 %v1232_v17 }
  0x49   :  { %1169 = vmatpush3.bf16.msra.mxu1 %v1232_v17  ;;  %1152 = vmatprep.subr.bf16.mxu0 %v1233_v18 }
  0x4a   :  { %1097 = vmatmul.mubr.bf16.gmra.mrb[4].mxu1 %v35_v15  ;;  %1166 = vmatprep.subr.bf16.mxu1 %v1233_v18 }
  0x4b   :  { %1145 = vmatmul.mubr.bf16.gmra.mrb[4].mxu0 %v468_v16 }
  0x4c   :  { %1153 = vmatpush3.bf16.msra.mxu0 %v1233_v18 }
  0x4d   :  { %1170 = vmatpush3.bf16.msra.mxu1 %v1233_v18  ;;  %1154 = vmatprep.subr.bf16.mxu0 %v1234_v19 }
  0x4e   :  { %1167 = vmatprep.subr.bf16.mxu1 %v1234_v19 }
  0x50   :  { %1155 = vmatpush3.bf16.msra.mxu0 %v1234_v19 }
  0x51   :  { %1171 = vmatpush3.bf16.msra.mxu1 %v1234_v19 }
 0x115   :  { %v1094_v20 = vpop.f32.mrb[0].mxu1 }
 0x116   :  { %v1142_v21 = vpop.f32.mrb[0].mxu0  ;;  %v276_v23 = vpop.f32.mrb[1].mxu1 }
 0x117   :  { %v1172_v24 = vadd.f32 %v1142_v21, %v1094_v20  ;;  %v568_v25 = vpop.f32.mrb[1].mxu0  ;;  %v1095_v26 = vpop.f32.mrb[2].mxu1 }
 0x118   :  { %v1173_v27 = vadd.f32 %v568_v25, %v276_v23  ;;  %v1143_v28 = vpop.f32.mrb[2].mxu0  ;;  %v279_v29 = vpop.f32.mrb[3].mxu1 }
 0x119   :  { %v616_v30 = vadd.f32 %v1172_v24, %v937_v22  ;;  %v1174_v31 = vadd.f32 %v1143_v28, %v1095_v26  ;;  %v571_v32 = vpop.f32.mrb[3].mxu0 }
 0x11a   :  { %v614_v33 = vadd.f32 %v1173_v27, %v937_v22  ;;  %v1175_v34 = vadd.f32 %v571_v32, %v279_v29 }
 0x11b   :  { %v624_v35 = vmax.f32 %v616_v30, 0.0  ;;  %v617_v36 = vadd.f32 %v1174_v31, %v937_v22 }
 0x11c   :  { %v622_v37 = vmax.f32 %v614_v33, 0.0  ;;  %v615_v38 = vadd.f32 %v1175_v34, %v937_v22 }
 0x11d   :  { %v965_v39 = vpack.c.bf16 %v624_v35, %v624_v35  ;;  %v625_v40 = vmax.f32 %v617_v36, 0.0  ;;  %v1098_v41 = vpop.f32.mrb[4].mxu1 }
 0x11e   :  { %v963_v42 = vpack.c.bf16 %v622_v37, %v622_v37  ;;  %v623_v43 = vmax.f32 %v615_v38, 0.0  ;;  %v1146_v44 = vpop.f32.mrb[4].mxu0  ;;  %v292_v45 = vpop.f32.mrb[5].mxu1 }
 0x11f   :  { %665 = vst.msk [vmem:[#allocation2 + $0x8] sm:$0xf] %vm662_vm0, %v965_v39  ;;  %v631_v46 = vpack.c.bf16 %v625_v40, %v624_v35  ;;  %v966_v47 = vpack.c.bf16 %v625_v40, %v625_v40  ;;  %v1176_v48 = vadd.f32 %v1146_v44, %v1098_v41  ;;  %v584_v49 = vpop.f32.mrb[5].mxu0  ;;  %v1099_v50 = vpop.f32.mrb[6].mxu1 }
 0x120   :  { %663 = vst.msk [vmem:[#allocation2] sm:$0xf] %vm662_vm0, %v963_v42  ;;  %v630_v51 = vpack.c.bf16 %v623_v43, %v622_v37  ;;  %v964_v52 = vpack.c.bf16 %v623_v43, %v623_v43  ;;  %v1177_v53 = vadd.f32 %v584_v49, %v292_v45  ;;  %v1147_v54 = vpop.f32.mrb[6].mxu0  ;;  %v295_v55 = vpop.f32.mrb[7].mxu1 }
 0x121   :  { %666 = vst.msk [vmem:[#allocation2 + $0xc] sm:$0xf] %vm662_vm0, %v966_v47  ;;  %v620_v56 = vadd.f32 %v1176_v48, %v937_v22  ;;  %v1178_v57 = vadd.f32 %v1147_v54, %v1099_v50  ;;  %v587_v58 = vpop.f32.mrb[7].mxu0 }
 0x122   :  { %664 = vst.msk [vmem:[#allocation2 + $0x4] sm:$0xf] %vm662_vm0, %v964_v52  ;;  %v618_v59 = vadd.f32 %v1177_v53, %v937_v22  ;;  %v1179_v60 = vadd.f32 %v587_v58, %v295_v55  ;;  %1156 = vmatprep.mubr.msk.bf16.mxu0 %vm711_vm1, %v630_v51 }
 0x123   :  { %v628_v61 = vmax.f32 %v620_v56, 0.0  ;;  %v621_v62 = vadd.f32 %v1178_v57, %v937_v22  ;;  %1157 = vmatmul.mubr.msk.bf16.vlgmr.msra.gmra.mrb[8].mxu0 %vm711_vm1, %v631_v46 }
 0x124   :  { %v626_v63 = vmax.f32 %v618_v59, 0.0  ;;  %v619_v0 = vadd.f32 %v1179_v60, %v937_v22 }
 0x125   :  { %v969_v1 = vpack.c.bf16 %v628_v61, %v628_v61  ;;  %v629_v2 = vmax.f32 %v621_v62, 0.0 }
 0x126   :  { %v967_v3 = vpack.c.bf16 %v626_v63, %v626_v63  ;;  %v627_v4 = vmax.f32 %v619_v0, 0.0 }
 0x127   :  { %669 = vst.msk [vmem:[#allocation2 + $0x18] sm:$0xf] %vm662_vm0, %v969_v1  ;;  %v633_v5 = vpack.c.bf16 %v629_v2, %v628_v61  ;;  %v970_v6 = vpack.c.bf16 %v629_v2, %v629_v2 }
 0x128   :  { %667 = vst.msk [vmem:[#allocation2 + $0x10] sm:$0xf] %vm662_vm0, %v967_v3  ;;  %v632_v7 = vpack.c.bf16 %v627_v4, %v626_v63  ;;  %v968_v8 = vpack.c.bf16 %v627_v4, %v627_v4 }
 0x129   :  { %671 = vst.msk [vmem:[#allocation2 + $0x1c] sm:$0x3] %vm670_vm2, %v970_v6 }
 0x12a   :  { %668 = vst.msk [vmem:[#allocation2 + $0x14] sm:$0xf] %vm662_vm0, %v968_v8  ;;  %1160 = vmatprep.mubr.msk.bf16.mxu1 %vm711_vm1, %v632_v7 }
 0x12b   :  { %1161 = vmatmul.mubr.msk.bf16.vlgmr.msra.gmra.mrb[8].mxu1 %vm711_vm1, %v633_v5 }
 0x12c   :  { %1246 = shalt.err (!%p1243_p4)
}
 0x12d   :  { %s1247_s15 = scalar_lea.hbm %s1550_s5, 512 }
 0x12e   :  { %p1248_p5 = scmp.ne.s32.totalorder %s1550_s5, %s1247_s15  ;;  %p1251_p6 = scmp.lt.u32.totalorder %s1247_s15, %s1550_s5 }
 0x130   :  { %p1253_p7 = pnand %p1251_p6, %p1248_p5 }
 0x132   :  { %1256 = shalt.err (!%p1253_p7)
}
 0x133   :  { %s1260_s20 = smov 64   ;;  %s1261_s21 = smov 4   ;;  %v946_v9 = vld [vmem:[%s1549_s4] ss:$0 sm:$0xff] }
 0x134   :  { %848 = dma.vmem_to_hbm [thread:$0]  %s843_s3, 512, %s1550_s5, [#allocation3], %s1260_s20, %s1260_s20, %s1261_s21  }
 0x1f6   :  { %v1158_v10 = vpop.f32.mrb[8].mxu0 }
 0x1f7   :  { %v767_v11 = vadd.f32 %v1158_v10, %v946_v9  ;;  %v758_v12 = vpop.f32.mrb[9].mxu0 }
 0x1f8   :  { %v759_v13 = vadd.f32 %v946_v9, %v758_v12  ;;  %v1159_v14 = vpop.f32.mrb[10].mxu0 }
 0x1f9   :  { %v770_v15 = vadd.f32 %v1159_v14, %v946_v9  ;;  %v761_v16 = vpop.f32.mrb[11].mxu0  ;;  %v791_v18 = vmax.f32 %v767_v11, 0.0 }
 0x1fa   :  { %v762_v17 = vadd.f32 %v946_v9, %v761_v16  ;;  %v789_v20 = vmax.f32 %v759_v13, 0.0 }
 0x1fb   :  { %v792_v19 = vmax.f32 %v770_v15, 0.0 }
 0x1fc   :  { %v790_v21 = vmax.f32 %v762_v17, 0.0 }
 0x1fd   :  { %v987_v22 = vpack.c.bf16 %v792_v19, %v791_v18 }
 0x1fe   :  { %v982_v23 = vpack.c.bf16 %v790_v21, %v789_v20  ;;  %v1162_v24 = vpop.f32.mrb[8].mxu1 }
 0x1ff   :  { %994 = vst [vmem:[%s1551_s6 + $0x8] sm:$0xff] %v987_v22   ;;  %v783_v25 = vadd.f32 %v1162_v24, %v946_v9  ;;  %v774_v26 = vpop.f32.mrb[9].mxu1 }
 0x200   :  { %983 = vst [vmem:[%s1551_s6] sm:$0xff] %v982_v23   ;;  %v775_v27 = vadd.f32 %v946_v9, %v774_v26  ;;  %v1163_v28 = vpop.f32.mrb[10].mxu1 }
 0x201   :  { %v795_v29 = vmax.f32 %v783_v25, 0.0  ;;  %v786_v30 = vadd.f32 %v1163_v28, %v946_v9  ;;  %v777_v31 = vpop.f32.mrb[11].mxu1 }
 0x202   :  { %v778_v32 = vadd.f32 %v946_v9, %v777_v31  ;;  %v793_v35 = vmax.f32 %v775_v27, 0.0 }
 0x203   :  { %v977_v33 = vpack.c.bf16 %v795_v29, %v795_v29  ;;  %v796_v34 = vmax.f32 %v786_v30, 0.0 }
 0x204   :  { %v794_v36 = vmax.f32 %v778_v32, 0.0 }
 0x205   :  { %835 = vst [vmem:[%s1551_s6 + $0x18] sm:$0xf] %v977_v33  ;;  %v978_v37 = vpack.c.bf16 %v796_v34, %v796_v34 }
 0x206   :  { %v992_v38 = vpack.c.bf16 %v794_v36, %v793_v35 }
 0x207   :  { %836 = vst [vmem:[%s1551_s6 + $0x1c] sm:$0x3] %v978_v37 }
 0x208   :  { %995 = vst [vmem:[%s1551_s6 + $0x10] sm:$0xff] %v992_v38  }
 0x209   :  { %1257 = dma.done.wait [#allocation3], 512  }
 0x20a   :  { %1258 = vsyncadd [#allocation3], 4294966784 }
 0x20b   :  { %856 = vsyncpa [#allocation3], 1 }

// kernel: sparse_bev_oe_forward.5
= control target key start
LH: loop header
LB: loop body
LE: loop exit
PB: predicated region body
PF: predicated region fallthrough
CT: control target
= control target key end

     0   :  { %v586_v0 = vmov 0.0   ;;  %vm587_vm0 = vmmov 0   ;;  %vm181_vm1 = vcmask 654336   ;;  %s740_s1 = inlined_call_operand.vmem [shape: bf16[2,80,128], index: 1, kind: input, shape index: {}]   ;;  %s741_s0 = inlined_call_operand.vmem [shape: bf16[8,128], index: 0, kind: input, shape index: {}]   ;;  %s742_s2 = inlined_call_operand.vmem [shape: bf16[128,128], index: 2, kind: input, shape index: {}]   ;;  %s743_s3 = inlined_call_operand.vmem [shape: f32[1,128], index: 3, kind: input, shape index: {}]   ;;  %s744_s4 = inlined_call_operand.vmem [shape: bf16[16,128], index: 4, kind: output, shape index: {}]  }
   0x1   :  { %482 = vmatprep.subr.bf16.mxu0 %v586_v0  ;;  %v560_v1 = vld [vmem:[%s740_s1] sm:$0xff]   ;;  %496 = vmatprep.subr.bf16.mxu1 %v586_v0  ;;  %v621_v2 = vld [vmem:[%s740_s1 + $0x28] sm:$0xff]   ;;  %v636_v4 = vld [vmem:[%s740_s1 + $0x30] sm:$0xff]  }
   0x2   :  { %492 = vmatprep.mubr.msk.bf16.mxu0 %vm587_vm0, %v586_v0  ;;  %506 = vmatprep.mubr.msk.bf16.mxu1 %vm587_vm0, %v586_v0  ;;  %v562_v3 = vld [vmem:[%s740_s1 + $0x8] sm:$0xff]   ;;  %v564_v5 = vld [vmem:[%s740_s1 + $0x10] sm:$0xff]   ;;  %v647_v6 = vld [vmem:[%s740_s1 + $0x38] sm:$0xff]  }
   0x3   :  { %483 = vmatpush3.bf16.xpose.msra.mxu0 %v560_v1  ;;  %497 = vmatpush3.bf16.xpose.msra.mxu1 %v621_v2  ;;  %v566_v7 = vld [vmem:[%s740_s1 + $0x18] sm:$0xff]   ;;  %v658_v8 = vld [vmem:[%s740_s1 + $0x40] sm:$0xff]   ;;  %v669_v10 = vld [vmem:[%s740_s1 + $0x48] sm:$0xff]  }
   0x4   :  { %484 = vmatprep.subr.bf16.mxu0 %v586_v0  ;;  %498 = vmatprep.subr.bf16.mxu1 %v586_v0  ;;  %v568_v9 = vld [vmem:[%s740_s1 + $0x20] sm:$0xff]   ;;  %v571_v35 = vld [vmem:[%s742_s2 + $0x8] sm:$0xff]   ;;  %v572_v36 = vld [vmem:[%s742_s2 + $0x10] sm:$0xff]  }
   0x5   :  { %v38_v11 = vld [vmem:[%s741_s0] sm:$0xf]  ;;  %v573_v45 = vld [vmem:[%s742_s2 + $0x18] sm:$0xff]   ;;  %v575_v47 = vld [vmem:[%s742_s2 + $0x28] sm:$0xff]  }
   0x6   :  { %v570_v34 = vld [vmem:[%s742_s2] sm:$0xff]   ;;  %v576_v48 = vld [vmem:[%s742_s2 + $0x30] sm:$0xff]   ;;  %v577_v49 = vld [vmem:[%s742_s2 + $0x38] sm:$0xff]  }
   0x7   :  { %v574_v46 = vld [vmem:[%s742_s2 + $0x20] sm:$0xff]  }
   0x8   :  { %v431_v59 = vld [vmem:[%s743_s3] ss:$0 sm:$0xff] }
   0xb   :  { %485 = vmatpush3.bf16.xpose.msra.mxu0 %v562_v3  ;;  %499 = vmatpush3.bf16.xpose.msra.mxu1 %v636_v4 }
   0xc   :  { %486 = vmatprep.subr.bf16.mxu0 %v586_v0  ;;  %500 = vmatprep.subr.bf16.mxu1 %v586_v0 }
  0x13   :  { %487 = vmatpush3.bf16.xpose.msra.mxu0 %v564_v5  ;;  %501 = vmatpush3.bf16.xpose.msra.mxu1 %v647_v6 }
  0x14   :  { %488 = vmatprep.subr.bf16.mxu0 %v586_v0  ;;  %502 = vmatprep.subr.bf16.mxu1 %v586_v0 }
  0x1b   :  { %489 = vmatpush3.bf16.xpose.msra.mxu0 %v566_v7  ;;  %503 = vmatpush3.bf16.xpose.msra.mxu1 %v658_v8 }
  0x1c   :  { %490 = vmatprep.subr.bf16.mxu0 %v586_v0  ;;  %504 = vmatprep.subr.bf16.mxu1 %v586_v0 }
  0x23   :  { %491 = vmatpush3.bf16.xpose.msra.mxu0 %v568_v9  ;;  %505 = vmatpush3.bf16.xpose.msra.mxu1 %v669_v10 }
  0x24   :  { %538 = vmatprep.subr.bf16.mxu0 %v586_v0  ;;  %510 = vmatprep.subr.bf16.mxu1 %v586_v0 }
  0x2a   :  { %493 = vmatmul.mubr.bf16.vlgmr.msra.gmra.mrb[0].mxu0 %v38_v11  ;;  %507 = vmatmul.mubr.bf16.vlgmr.msra.gmra.mrb[0].mxu1 %v38_v11 }
  0x2b   :  { %554 = vmatprep.mubr.msk.bf16.mxu0 %vm587_vm0, %v586_v0  ;;  %511 = vmatpush3.bf16.msra.mxu1 %v560_v1 }
  0x2c   :  { %520 = vmatprep.mubr.msk.bf16.mxu1 %vm587_vm0, %v586_v0  ;;  %512 = vmatprep.subr.bf16.mxu1 %v586_v0 }
  0x2d   :  { %539 = vmatpush3.bf16.msra.mxu0 %v570_v34 }
  0x2e   :  { %540 = vmatprep.subr.bf16.mxu0 %v586_v0 }
  0x2f   :  { %513 = vmatpush3.bf16.msra.mxu1 %v562_v3 }
  0x30   :  { %514 = vmatprep.subr.bf16.mxu1 %v586_v0 }
  0x31   :  { %541 = vmatpush3.bf16.msra.mxu0 %v571_v35 }
  0x32   :  { %542 = vmatprep.subr.bf16.mxu0 %v586_v0 }
  0x33   :  { %515 = vmatpush3.bf16.msra.mxu1 %v564_v5 }
  0x34   :  { %516 = vmatprep.subr.bf16.mxu1 %v586_v0 }
  0x35   :  { %543 = vmatpush3.bf16.msra.mxu0 %v572_v36 }
  0x36   :  { %544 = vmatprep.subr.bf16.mxu0 %v586_v0 }
  0x37   :  { %517 = vmatpush3.bf16.msra.mxu1 %v566_v7 }
  0x38   :  { %518 = vmatprep.subr.bf16.mxu1 %v586_v0 }
  0x39   :  { %545 = vmatpush3.bf16.msra.mxu0 %v573_v45 }
  0x3a   :  { %546 = vmatprep.subr.bf16.mxu0 %v586_v0 }
  0x3b   :  { %519 = vmatpush3.bf16.msra.mxu1 %v568_v9 }
  0x3c   :  { %524 = vmatprep.subr.bf16.mxu1 %v586_v0 }
  0x3d   :  { %547 = vmatpush3.bf16.msra.mxu0 %v574_v46 }
  0x3e   :  { %548 = vmatprep.subr.bf16.mxu0 %v586_v0 }
  0x41   :  { %549 = vmatpush3.bf16.msra.mxu0 %v575_v47 }
  0x42   :  { %550 = vmatprep.subr.bf16.mxu0 %v586_v0 }
  0x45   :  { %551 = vmatpush3.bf16.msra.mxu0 %v576_v48 }
  0x46   :  { %552 = vmatprep.subr.bf16.mxu0 %v586_v0 }
  0x49   :  { %553 = vmatpush3.bf16.msra.mxu0 %v577_v49 }
  0xfd   :  { %v103_v12 = vpop.f32.mrb[0].mxu0  ;;  %v173_v15 = vpop.f32.mrb[0].mxu1 }
  0xfe   :  { %v179_v13 = vmul.f32 0.17677669, %v103_v12  ;;  %v494_v14 = vpop.f32.mrb[1].mxu0  ;;  %v180_v17 = vmul.f32 0.17677669, %v173_v15  ;;  %v508_v18 = vpop.f32.mrb[1].mxu1 }
  0xff   :  { %v106_v16 = vpop.f32.mrb[2].mxu0  ;;  %v176_v21 = vpop.f32.mrb[2].mxu1 }
 0x100   :  { %v495_v19 = vpop.f32.mrb[3].mxu0  ;;  %v182_v20 = vsel %vm181_vm1, %v179_v13, -inf  ;;  %v509_v22 = vpop.f32.mrb[3].mxu1  ;;  %v185_v23 = vsel %vm181_vm1, %v180_v17, -inf }
 0x101   :  { %183 = vmax.xlane.f32.xlu0 %v182_v20 }
 0x105   :  { %186 = vmax.xlane.f32.xlu0 %v185_v23 }
 0x18e   :  { %v184_v24 = vpop.xlane.xlu0 %183 }
 0x18f   :  { %v188_v25 = vsub.f32 %v179_v13, %v184_v24 }
 0x191   :  { %v190_v26 = vmul.f32 1.442695, %v188_v25 }
 0x192   :  { %v187_v27 = vpop.xlane.xlu0 %186 }
 0x193   :  { %578 = vpow2.f32 %v190_v26  ;;  %v189_v28 = vsub.f32 %v180_v17, %v187_v27 }
 0x195   :  { %v192_v29 = vmul.f32 1.442695, %v189_v28 }
 0x197   :  { %580 = vpow2.f32 %v192_v29 }
 0x19d   :  { %v579_v30 = vpop.eup %578 }
 0x19e   :  { %v194_v31 = vsel %vm181_vm1, %v579_v30, 0.0 }
 0x19f   :  { %195 = vadd.xlane.f32.xlu1 %v194_v31 }
 0x1a1   :  { %v581_v32 = vpop.eup %580 }
 0x1a2   :  { %v197_v33 = vsel %vm181_vm1, %v581_v32, 0.0 }
 0x1a3   :  { %198 = vadd.xlane.f32.xlu1 %v197_v33 }
 0x22c   :  { %v196_v37 = vpop.xlane.xlu1 %195 }
 0x22d   :  { %582 = vrcp.f32 %v196_v37 }
 0x230   :  { %v199_v40 = vpop.xlane.xlu1 %198 }
 0x231   :  { %584 = vrcp.f32 %v199_v40 }
 0x237   :  { %v583_v38 = vpop.eup %582 }
 0x238   :  { %v202_v39 = vmul.f32 %v583_v38, %v579_v30 }
 0x23a   :  { %v204_v41 = vpack.c.bf16 %v202_v39, %v202_v39 }
 0x23b   :  { %v585_v42 = vpop.eup %584 }
 0x23c   :  { %521 = vmatmul.mubr.msk.bf16.vlgmr.msra.gmra.mrb[4].mxu1 %vm181_vm1, %v204_v41  ;;  %v203_v43 = vmul.f32 %v585_v42, %v581_v32 }
 0x23d   :  { %525 = vmatpush3.bf16.msra.mxu1 %v621_v2  ;;  %534 = vmatprep.mubr.msk.bf16.mxu1 %vm587_vm0, %v586_v0 }
 0x23e   :  { %526 = vmatprep.subr.bf16.mxu1 %v586_v0  ;;  %v205_v44 = vpack.c.bf16 %v203_v43, %v203_v43 }
 0x241   :  { %527 = vmatpush3.bf16.msra.mxu1 %v636_v4 }
 0x242   :  { %528 = vmatprep.subr.bf16.mxu1 %v586_v0 }
 0x245   :  { %529 = vmatpush3.bf16.msra.mxu1 %v647_v6 }
 0x246   :  { %530 = vmatprep.subr.bf16.mxu1 %v586_v0 }
 0x249   :  { %531 = vmatpush3.bf16.msra.mxu1 %v658_v8 }
 0x24a   :  { %532 = vmatprep.subr.bf16.mxu1 %v586_v0 }
 0x24d   :  { %533 = vmatpush3.bf16.msra.mxu1 %v669_v10 }
 0x250   :  { %535 = vmatmul.mubr.msk.bf16.vlgmr.msra.gmra.mrb[8].mxu1 %vm181_vm1, %v205_v44 }
 0x30f   :  { %v243_v50 = vpop.f32.mrb[4].mxu1 }
 0x310   :  { %v522_v51 = vpop.f32.mrb[5].mxu1 }
 0x311   :  { %v246_v52 = vpop.f32.mrb[6].mxu1 }
 0x312   :  { %v523_v53 = vpop.f32.mrb[7].mxu1 }
 0x323   :  { %v286_v54 = vpop.f32.mrb[8].mxu1 }
 0x324   :  { %v292_v55 = vpack.c.bf16 %v286_v54, %v243_v50  ;;  %v536_v56 = vpop.f32.mrb[9].mxu1 }
 0x325   :  { %v289_v57 = vpop.f32.mrb[10].mxu1 }
 0x326   :  { %v537_v58 = vpop.f32.mrb[11].mxu1  ;;  %555 = vmatmul.mubr.bf16.vlgmr.msra.gmra.mrb[4].mxu0 %v292_v55 }
 0x3f9   :  { %v398_v60 = vpop.f32.mrb[4].mxu0 }
 0x3fa   :  { %v556_v61 = vpop.f32.mrb[5].mxu0  ;;  %v399_v63 = vadd.f32 %v431_v59, %v398_v60 }
 0x3fb   :  { %v401_v62 = vpop.f32.mrb[6].mxu0 }
 0x3fc   :  { %v402_v0 = vadd.f32 %v431_v59, %v401_v62  ;;  %v557_v1 = vpop.f32.mrb[7].mxu0 }
 0x3fe   :  { %v447_v2 = vpack.c.bf16 %v402_v0, %v399_v63 }
 0x400   :  { %448 = vst [vmem:[%s744_s4] sm:$0xff] %v447_v2  }

</bundles_post_ra>
